<compile_context>
chip_gen: v6e
topology: v6e:2x2x1
jax: 0.10.0
libtpu: 0.0.40
codegen_flags: <defaults>
</compile_context>

<pallas_src>
import jax
import jax.numpy as jnp
from jax.experimental import pallas as pl
from jax.experimental.pallas import tpu as pltpu


def _fp_kernel(xyz1_ref, xyz2t_ref, sq2_ref, a_ref, p1_ref,
               w0b_ref, b0_ref, w1_ref, b1_ref,
               out_ref):
    x1 = xyz1_ref[0]        # (3, TN)    query coords, points on lane axis
    x2 = xyz2t_ref[0]       # (M, 3)     reference coords
    x2sq = sq2_ref[0]       # (M, 1)     ||xyz2||^2 (precomputed in wrapper)
    a = a_ref[0]            # (mlp0, M)  A = w0a @ points2 (interp folded in)
    p1 = p1_ref[0]          # (C1, TN)   skip-link features

    M = x2.shape[0]
    TN = x1.shape[1]

    # Pairwise *squared* distances on the MXU (pointnet2's three_nn returns
    # squared distances): d[m, n] = ||x2_m||^2 + ||x1_n||^2 - 2 <x2_m, x1_n>.
    x1sq = jnp.sum(x1 * x1, axis=0, keepdims=True)                     # (1, TN)
    cross = jnp.dot(x2, x1, preferred_element_type=jnp.float32)        # (M, TN)
    d = (x2sq + x1sq) - 2.0 * cross

    # 3 nearest neighbours per query point (tie-break on smallest index).
    # Build a sparse (M, TN) *unnormalised* inverse-distance weight matrix so
    # the interpolation + MLP layer 0 becomes an MXU matmul; the normalisation
    # is applied afterwards as a (1, TN) column scale (no (M, TN) divide).
    row_ids = jax.lax.broadcasted_iota(jnp.int32, (M, TN), 0)
    big = jnp.float32(1e30)
    w_mat = jnp.zeros((M, TN), jnp.float32)
    recip_sum = jnp.zeros((1, TN), jnp.float32)
    for _ in range(3):
        dmin = jnp.min(d, axis=0, keepdims=True)                       # (1, TN)
        amin = jnp.min(jnp.where(d == dmin, row_ids, M),
                       axis=0, keepdims=True)                          # (1, TN)
        sel = row_ids == amin                                          # one-hot
        recip = 1.0 / jnp.maximum(dmin, 1e-10)                         # clamp_min
        recip_sum = recip_sum + recip
        w_mat = jnp.where(sel, recip, w_mat)
        d = jnp.where(sel, big, d)
    inv_norm = 1.0 / recip_sum                                         # (1, TN)

    # MLP layer 0 with three_interpolate + channel concat folded in:
    #   w0a @ (points2 @ W_norm) + w0b @ p1 = (A @ W_unnorm) * inv_norm + w0b @ p1
    # BN scale is already folded into the weights; only the shift is added.
    h = jnp.dot(a, w_mat, preferred_element_type=jnp.float32) * inv_norm
    h = h + jnp.dot(w0b_ref[...], p1, preferred_element_type=jnp.float32)
    h = jnp.maximum(h + b0_ref[...], 0.0)

    # MLP layer 1
    h = jnp.dot(w1_ref[...], h, preferred_element_type=jnp.float32)
    h = jnp.maximum(h + b1_ref[...], 0.0)

    out_ref[0] = h.astype(out_ref.dtype)


def pointnet_fp_forward(xyz1, xyz2, points1, points2, params, *, tn=512):
    """xyz1:(B,3,N) xyz2:(B,3,M) points1:(B,C1,N) points2:(B,C2,M) -> (B,mlp[-1],N)."""
    B, _, N = xyz1.shape
    M = xyz2.shape[2]
    C1 = points1.shape[1]
    mlp0 = params["w0a"].shape[0]
    mlp1 = params["w1"].shape[0]

    # Tile size: lane-dense multiple of 128, as large as useful (>=256 fills
    # the 256-wide MXU on v6e/v7x, 512 amortises per-step overhead) but never
    # larger than the padded N so tiny inputs don't do wasted work.
    np_min = pl.cdiv(N, 128) * 128
    tn = max(128, min(tn, np_min))
    n_tiles = pl.cdiv(N, tn)
    Np = n_tiles * tn
    if Np != N:
        pad = ((0, 0), (0, 0), (0, Np - N))
        xyz1 = jnp.pad(xyz1, pad)
        points1 = jnp.pad(points1, pad)

    xyz2_t = jnp.transpose(xyz2, (0, 2, 1))                 # (B, M, 3) -- tiny
    sq2 = jnp.sum(xyz2 * xyz2, axis=1)[:, :, None]          # (B, M, 1)
    # Fold the interpolation matmul into MLP layer 0 (exact: layer 0 is linear
    # before the ReLU): A_b = w0a @ points2_b, shape (B, mlp0, M).
    a_fold = jnp.einsum("oc,bcm->bom", params["w0a"], points2, precision="highest")

    tile = lambda b, j: (b, 0, j)
    full = lambda b, j: (b, 0, 0)     # batch-only blocks: DMA'd once per batch
    wmap = lambda b, j: (0, 0)        # weights: DMA'd once total

    out = pl.pallas_call(
        _fp_kernel,
        out_shape=jax.ShapeDtypeStruct((B, mlp1, Np), jnp.float32),
        grid=(B, n_tiles),            # b outer, n-tile inner (fastest)
        in_specs=[
            pl.BlockSpec((1, 3, tn), tile),      # xyz1 tile
            pl.BlockSpec((1, M, 3), full),       # xyz2 (transposed, full M)
            pl.BlockSpec((1, M, 1), full),       # ||xyz2||^2
            pl.BlockSpec((1, mlp0, M), full),    # A = w0a @ points2 (BN-scaled)
            pl.BlockSpec((1, C1, tn), tile),     # points1 tile
            pl.BlockSpec((mlp0, C1), wmap),      # w0b (points1 part, BN-scaled)
            pl.BlockSpec((mlp0, 1), wmap),       # shift 0
            pl.BlockSpec((mlp1, mlp0), wmap),    # w1 (BN-scaled)
            pl.BlockSpec((mlp1, 1), wmap),       # shift 1
        ],
        out_specs=pl.BlockSpec((1, mlp1, tn), tile),
        compiler_params=pltpu.CompilerParams(
            dimension_semantics=("parallel", "parallel"),
            vmem_limit_bytes=32 * 1024 * 1024),
    )(xyz1, xyz2_t, sq2, a_fold, points1,
      params["w0b"], params["b0"], params["w1"], params["b1"])

    return out[:, :, :N]


def make_params(key, in_channel, in_channel_points1, mlp):
    """Synthetic Conv1d + BatchNorm1d (eval mode) params; BN scale folded into W."""
    eps = 1e-5
    c_in = [in_channel + in_channel_points1, mlp[0]]
    c_out = list(mlp)
    keys = jax.random.split(key, 6 * len(mlp))
    folded = []
    for layer, (ci, co) in enumerate(zip(c_in, c_out)):
        kw, kb, kg, kbe, km, kv = keys[6 * layer:6 * (layer + 1)]
        w = jax.random.normal(kw, (co, ci), jnp.float32) * 0.1
        bias = jax.random.normal(kb, (co,), jnp.float32) * 0.1
        gamma = 1.0 + 0.1 * jax.random.normal(kg, (co,), jnp.float32)
        beta = 0.1 * jax.random.normal(kbe, (co,), jnp.float32)
        mean = 0.1 * jax.random.normal(km, (co,), jnp.float32)
        var = 0.5 + jnp.abs(jax.random.normal(kv, (co,), jnp.float32))
        scale = gamma / jnp.sqrt(var + eps)
        shift = scale * (bias - mean) + beta
        folded.append((w * scale[:, None], shift.reshape(co, 1)))
    (w0, b0), (w1, b1) = folded
    return {
        "w0a": w0[:, :in_channel],      # applied to interpolated features
        "w0b": w0[:, in_channel:],      # applied to points1 features
        "b0": b0,
        "w1": w1,
        "b1": b1,
    }


def fp_reference(xyz1, xyz2, points1, points2, params):
    """Pure-JAX reference with identical 3-NN / tie-break semantics.

    Distances use the same |a|^2 + |b|^2 - 2<a,b> decomposition as the kernel
    (algebraically identical to the direct form) so that float-level
    near-ties resolve to the same neighbours as the kernel.
    """
    B, _, N = xyz1.shape
    M = xyz2.shape[2]
    sq2 = jnp.sum(xyz2 * xyz2, axis=1)                        # (B, M)
    sq1 = jnp.sum(xyz1 * xyz1, axis=1)                        # (B, N)
    cross = jnp.einsum("bcm,bcn->bmn", xyz2, xyz1, precision="highest")
    d = (sq2[:, :, None] + sq1[:, None, :]) - 2.0 * cross     # (B, M, N) squared
    ids = jnp.arange(M, dtype=jnp.int32)[None, :, None]
    w = jnp.zeros((B, M, N), jnp.float32)
    rsum = jnp.zeros((B, 1, N), jnp.float32)
    for _ in range(3):
        dmin = jnp.min(d, axis=1, keepdims=True)
        amin = jnp.min(jnp.where(d == dmin, ids, M), axis=1, keepdims=True)
        sel = ids == amin
        recip = 1.0 / jnp.maximum(dmin, 1e-10)
        rsum = rsum + recip
        w = jnp.where(sel, recip, w)
        d = jnp.where(sel, jnp.float32(1e30), d)
    w = w / rsum
    interp = jnp.einsum("bcm,bmn->bcn", points2, w, precision="highest")
    feat = jnp.concatenate([interp, points1], axis=1)
    w0 = jnp.concatenate([params["w0a"], params["w0b"]], axis=1)
    h = jnp.maximum(jnp.einsum("oc,bcn->bon", w0, feat, precision="highest")
                    + params["b0"][None], 0.0)
    h = jnp.maximum(jnp.einsum("oc,bcn->bon", params["w1"], h, precision="highest")
                    + params["b1"][None], 0.0)
    return h


if __name__ == "__main__":
    B, N, M = 2, 256, 64
    C2, C1 = 32, 32                  # in_channel (points2), in_channel_points1
    mlp = [64, 32]

    key = jax.random.PRNGKey(0)
    k1, k2, k3, k4, kp = jax.random.split(key, 5)
    # Coordinates quantised to 1/16 so squared distances are exact in f32:
    # the 3-NN selection is then independent of the distance-computation order
    # (kernel MXU decomposition vs reference), avoiding spurious neighbour
    # flips in the test. Feature tensors stay full-precision normals.
    xyz1 = jnp.round(jax.random.normal(k1, (B, 3, N), jnp.float32) * 16.0) / 16.0
    xyz2 = jnp.round(jax.random.normal(k2, (B, 3, M), jnp.float32) * 16.0) / 16.0
    points1 = jax.random.normal(k3, (B, C1, N), jnp.float32)
    points2 = jax.random.normal(k4, (B, C2, M), jnp.float32)
    params = make_params(kp, C2, C1, mlp)

    out = pointnet_fp_forward(xyz1, xyz2, points1, points2, params, tn=512)
    jax.block_until_ready(out)

    ref = fp_reference(xyz1, xyz2, points1, points2, params)
    assert out.shape == (B, mlp[-1], N)
    max_err = float(jnp.max(jnp.abs(out - ref)))
    assert jnp.allclose(out, ref, atol=2e-4, rtol=2e-4), f"max abs err {max_err}"

    print("KERNEL_OK")
</pallas_src>

<mosaic_0001>
module attributes {stable_mosaic.version = 11 : i64} {
  func.func @_fp_kernel(%arg0: i32, %arg1: i32, %arg2: memref<1x3x256xf32, #tpu.memory_space<vmem>>, %arg3: memref<1x64x3xf32, #tpu.memory_space<vmem>>, %arg4: memref<1x64x1xf32, #tpu.memory_space<vmem>>, %arg5: memref<1x64x64xf32, #tpu.memory_space<vmem>>, %arg6: memref<1x32x256xf32, #tpu.memory_space<vmem>>, %arg7: memref<64x32xf32, #tpu.memory_space<vmem>>, %arg8: memref<64x1xf32, #tpu.memory_space<vmem>>, %arg9: memref<32x64xf32, #tpu.memory_space<vmem>>, %arg10: memref<32x1xf32, #tpu.memory_space<vmem>>, %arg11: memref<1x32x256xf32, #tpu.memory_space<vmem>>) attributes {dimension_semantics = [#tpu.dimension_semantics<parallel>, #tpu.dimension_semantics<parallel>], iteration_bounds = array<i64: 2, 1>, scalar_prefetch = 0 : i64, scratch_operands = 0 : i64, tpu.core_type = #tpu.core_type<tc>, window_params = [{transform_indices = @transform_0, window_bounds = array<i64: 1, 3, 256>}, {transform_indices = @transform_1, window_bounds = array<i64: 1, 64, 3>}, {transform_indices = @transform_2, window_bounds = array<i64: 1, 64, 1>}, {transform_indices = @transform_3, window_bounds = array<i64: 1, 64, 64>}, {transform_indices = @transform_4, window_bounds = array<i64: 1, 32, 256>}, {pipeline_mode = #tpu.pipeline_mode<synchronous>, transform_indices = @transform_5, window_bounds = array<i64: 64, 32>}, {pipeline_mode = #tpu.pipeline_mode<synchronous>, transform_indices = @transform_6, window_bounds = array<i64: 64, 1>}, {pipeline_mode = #tpu.pipeline_mode<synchronous>, transform_indices = @transform_7, window_bounds = array<i64: 32, 64>}, {pipeline_mode = #tpu.pipeline_mode<synchronous>, transform_indices = @transform_8, window_bounds = array<i64: 32, 1>}, {transform_indices = @transform_9, window_bounds = array<i64: 1, 32, 256>}]} {
    %c0 = arith.constant 0 : index
    %c0_0 = arith.constant 0 : index
    %c0_1 = arith.constant 0 : index
    %0 = vector.load %arg2[%c0, %c0_0, %c0_1] : memref<1x3x256xf32, #tpu.memory_space<vmem>>, vector<1x3x256xf32>
    %1 = vector.shape_cast %0 : vector<1x3x256xf32> to vector<3x256xf32>
    %c0_2 = arith.constant 0 : index
    %c0_3 = arith.constant 0 : index
    %c0_4 = arith.constant 0 : index
    %2 = vector.load %arg3[%c0_2, %c0_3, %c0_4] : memref<1x64x3xf32, #tpu.memory_space<vmem>>, vector<1x64x3xf32>
    %3 = vector.shape_cast %2 : vector<1x64x3xf32> to vector<64x3xf32>
    %c0_5 = arith.constant 0 : index
    %c0_6 = arith.constant 0 : index
    %c0_7 = arith.constant 0 : index
    %4 = vector.load %arg4[%c0_5, %c0_6, %c0_7] : memref<1x64x1xf32, #tpu.memory_space<vmem>>, vector<1x64x1xf32>
    %5 = vector.shape_cast %4 : vector<1x64x1xf32> to vector<64x1xf32>
    %c0_8 = arith.constant 0 : index
    %c0_9 = arith.constant 0 : index
    %c0_10 = arith.constant 0 : index
    %6 = vector.load %arg5[%c0_8, %c0_9, %c0_10] : memref<1x64x64xf32, #tpu.memory_space<vmem>>, vector<1x64x64xf32>
    %7 = vector.shape_cast %6 : vector<1x64x64xf32> to vector<64x64xf32>
    %c0_11 = arith.constant 0 : index
    %c0_12 = arith.constant 0 : index
    %c0_13 = arith.constant 0 : index
    %8 = vector.load %arg6[%c0_11, %c0_12, %c0_13] : memref<1x32x256xf32, #tpu.memory_space<vmem>>, vector<1x32x256xf32>
    %9 = vector.shape_cast %8 : vector<1x32x256xf32> to vector<32x256xf32>
    %10 = arith.mulf %1, %1 : vector<3x256xf32>
    %cst = arith.constant dense<0.000000e+00> : vector<256xf32>
    %11 = vector.multi_reduction <add>, %10, %cst [0] : vector<3x256xf32> to vector<256xf32>
    %12 = vector.shape_cast %11 : vector<256xf32> to vector<1x256xf32>
    %cst_14 = arith.constant dense<0.000000e+00> : vector<64x256xf32>
    %13 = tpu.matmul %3, %1, %cst_14 {dimension_numbers = #tpu.dot_dimension_numbers<[1], [0], [0], [1], [0, 0, 1, 1], [], []>} : vector<64x3xf32>, vector<3x256xf32>, vector<64x256xf32> -> vector<64x256xf32>
    %14 = vector.broadcast %5 : vector<64x1xf32> to vector<64x256xf32>
    %15 = vector.broadcast %12 : vector<1x256xf32> to vector<64x256xf32>
    %16 = arith.addf %14, %15 : vector<64x256xf32>
    %cst_15 = arith.constant 2.000000e+00 : f32
    %17 = vector.broadcast %cst_15 : f32 to vector<64x256xf32>
    %18 = arith.mulf %17, %13 : vector<64x256xf32>
    %19 = arith.subf %16, %18 : vector<64x256xf32>
    %20 = tpu.iota {dimensions = array<i32: 0>} : vector<64x256xi32>
    %cst_16 = arith.constant 0.000000e+00 : f32
    %21 = vector.broadcast %cst_16 : f32 to vector<64x256xf32>
    %cst_17 = arith.constant 0.000000e+00 : f32
    %22 = vector.broadcast %cst_17 : f32 to vector<1x256xf32>
    %cst_18 = arith.constant dense<0x7F800000> : vector<256xf32>
    %23 = vector.multi_reduction <minimumf>, %19, %cst_18 [0] : vector<64x256xf32> to vector<256xf32>
    %24 = vector.shape_cast %23 : vector<256xf32> to vector<1x256xf32>
    %25 = vector.broadcast %24 : vector<1x256xf32> to vector<64x256xf32>
    %26 = arith.cmpf oeq, %19, %25 : vector<64x256xf32>
    %c64_i32 = arith.constant 64 : i32
    %27 = vector.broadcast %c64_i32 : i32 to vector<64x256xi32>
    %28 = arith.select %26, %20, %27 : vector<64x256xi1>, vector<64x256xi32>
    %cst_19 = arith.constant dense<2147483647> : vector<256xi32>
    %29 = vector.multi_reduction <minsi>, %28, %cst_19 [0] : vector<64x256xi32> to vector<256xi32>
    %30 = vector.shape_cast %29 : vector<256xi32> to vector<1x256xi32>
    %31 = vector.broadcast %30 : vector<1x256xi32> to vector<64x256xi32>
    %32 = arith.cmpi eq, %20, %31 : vector<64x256xi32>
    %cst_20 = arith.constant 1.000000e-10 : f32
    %33 = vector.broadcast %cst_20 : f32 to vector<1x256xf32>
    %34 = arith.maximumf %24, %33 : vector<1x256xf32>
    %cst_21 = arith.constant 1.000000e+00 : f32
    %35 = vector.broadcast %cst_21 : f32 to vector<1x256xf32>
    %36 = arith.divf %35, %34 : vector<1x256xf32>
    %37 = arith.addf %22, %36 : vector<1x256xf32>
    %38 = vector.shape_cast %36 : vector<1x256xf32> to vector<1x256xf32>
    %39 = vector.broadcast %38 : vector<1x256xf32> to vector<64x256xf32>
    %40 = arith.select %32, %39, %21 : vector<64x256xi1>, vector<64x256xf32>
    %cst_22 = arith.constant 1.000000e+30 : f32
    %41 = vector.broadcast %cst_22 : f32 to vector<64x256xf32>
    %42 = arith.select %32, %41, %19 : vector<64x256xi1>, vector<64x256xf32>
    %cst_23 = arith.constant dense<0x7F800000> : vector<256xf32>
    %43 = vector.multi_reduction <minimumf>, %42, %cst_23 [0] : vector<64x256xf32> to vector<256xf32>
    %44 = vector.shape_cast %43 : vector<256xf32> to vector<1x256xf32>
    %45 = vector.broadcast %44 : vector<1x256xf32> to vector<64x256xf32>
    %46 = arith.cmpf oeq, %42, %45 : vector<64x256xf32>
    %c64_i32_24 = arith.constant 64 : i32
    %47 = vector.broadcast %c64_i32_24 : i32 to vector<64x256xi32>
    %48 = arith.select %46, %20, %47 : vector<64x256xi1>, vector<64x256xi32>
    %cst_25 = arith.constant dense<2147483647> : vector<256xi32>
    %49 = vector.multi_reduction <minsi>, %48, %cst_25 [0] : vector<64x256xi32> to vector<256xi32>
    %50 = vector.shape_cast %49 : vector<256xi32> to vector<1x256xi32>
    %51 = vector.broadcast %50 : vector<1x256xi32> to vector<64x256xi32>
    %52 = arith.cmpi eq, %20, %51 : vector<64x256xi32>
    %cst_26 = arith.constant 1.000000e-10 : f32
    %53 = vector.broadcast %cst_26 : f32 to vector<1x256xf32>
    %54 = arith.maximumf %44, %53 : vector<1x256xf32>
    %cst_27 = arith.constant 1.000000e+00 : f32
    %55 = vector.broadcast %cst_27 : f32 to vector<1x256xf32>
    %56 = arith.divf %55, %54 : vector<1x256xf32>
    %57 = arith.addf %37, %56 : vector<1x256xf32>
    %58 = vector.shape_cast %56 : vector<1x256xf32> to vector<1x256xf32>
    %59 = vector.broadcast %58 : vector<1x256xf32> to vector<64x256xf32>
    %60 = arith.select %52, %59, %40 : vector<64x256xi1>, vector<64x256xf32>
    %cst_28 = arith.constant 1.000000e+30 : f32
    %61 = vector.broadcast %cst_28 : f32 to vector<64x256xf32>
    %62 = arith.select %52, %61, %42 : vector<64x256xi1>, vector<64x256xf32>
    %cst_29 = arith.constant dense<0x7F800000> : vector<256xf32>
    %63 = vector.multi_reduction <minimumf>, %62, %cst_29 [0] : vector<64x256xf32> to vector<256xf32>
    %64 = vector.shape_cast %63 : vector<256xf32> to vector<1x256xf32>
    %65 = vector.broadcast %64 : vector<1x256xf32> to vector<64x256xf32>
    %66 = arith.cmpf oeq, %62, %65 : vector<64x256xf32>
    %c64_i32_30 = arith.constant 64 : i32
    %67 = vector.broadcast %c64_i32_30 : i32 to vector<64x256xi32>
    %68 = arith.select %66, %20, %67 : vector<64x256xi1>, vector<64x256xi32>
    %cst_31 = arith.constant dense<2147483647> : vector<256xi32>
    %69 = vector.multi_reduction <minsi>, %68, %cst_31 [0] : vector<64x256xi32> to vector<256xi32>
    %70 = vector.shape_cast %69 : vector<256xi32> to vector<1x256xi32>
    %71 = vector.broadcast %70 : vector<1x256xi32> to vector<64x256xi32>
    %72 = arith.cmpi eq, %20, %71 : vector<64x256xi32>
    %cst_32 = arith.constant 1.000000e-10 : f32
    %73 = vector.broadcast %cst_32 : f32 to vector<1x256xf32>
    %74 = arith.maximumf %64, %73 : vector<1x256xf32>
    %cst_33 = arith.constant 1.000000e+00 : f32
    %75 = vector.broadcast %cst_33 : f32 to vector<1x256xf32>
    %76 = arith.divf %75, %74 : vector<1x256xf32>
    %77 = arith.addf %57, %76 : vector<1x256xf32>
    %78 = vector.shape_cast %76 : vector<1x256xf32> to vector<1x256xf32>
    %79 = vector.broadcast %78 : vector<1x256xf32> to vector<64x256xf32>
    %80 = arith.select %72, %79, %60 : vector<64x256xi1>, vector<64x256xf32>
    %cst_34 = arith.constant 1.000000e+00 : f32
    %81 = vector.broadcast %cst_34 : f32 to vector<1x256xf32>
    %82 = arith.divf %81, %77 : vector<1x256xf32>
    %cst_35 = arith.constant dense<0.000000e+00> : vector<64x256xf32>
    %83 = tpu.matmul %7, %80, %cst_35 {dimension_numbers = #tpu.dot_dimension_numbers<[1], [0], [0], [1], [0, 0, 1, 1], [], []>} : vector<64x64xf32>, vector<64x256xf32>, vector<64x256xf32> -> vector<64x256xf32>
    %84 = vector.broadcast %82 : vector<1x256xf32> to vector<64x256xf32>
    %85 = arith.mulf %83, %84 : vector<64x256xf32>
    %c0_36 = arith.constant 0 : index
    %c0_37 = arith.constant 0 : index
    %86 = vector.load %arg7[%c0_36, %c0_37] : memref<64x32xf32, #tpu.memory_space<vmem>>, vector<64x32xf32>
    %cst_38 = arith.constant dense<0.000000e+00> : vector<64x256xf32>
    %87 = tpu.matmul %86, %9, %cst_38 {dimension_numbers = #tpu.dot_dimension_numbers<[1], [0], [0], [1], [0, 0, 1, 1], [], []>} : vector<64x32xf32>, vector<32x256xf32>, vector<64x256xf32> -> vector<64x256xf32>
    %88 = arith.addf %85, %87 : vector<64x256xf32>
    %c0_39 = arith.constant 0 : index
    %c0_40 = arith.constant 0 : index
    %89 = vector.load %arg8[%c0_39, %c0_40] : memref<64x1xf32, #tpu.memory_space<vmem>>, vector<64x1xf32>
    %90 = vector.broadcast %89 : vector<64x1xf32> to vector<64x256xf32>
    %91 = arith.addf %88, %90 : vector<64x256xf32>
    %cst_41 = arith.constant 0.000000e+00 : f32
    %92 = vector.broadcast %cst_41 : f32 to vector<64x256xf32>
    %93 = arith.maximumf %91, %92 : vector<64x256xf32>
    %c0_42 = arith.constant 0 : index
    %c0_43 = arith.constant 0 : index
    %94 = vector.load %arg9[%c0_42, %c0_43] : memref<32x64xf32, #tpu.memory_space<vmem>>, vector<32x64xf32>
    %cst_44 = arith.constant dense<0.000000e+00> : vector<32x256xf32>
    %95 = tpu.matmul %94, %93, %cst_44 {dimension_numbers = #tpu.dot_dimension_numbers<[1], [0], [0], [1], [0, 0, 1, 1], [], []>} : vector<32x64xf32>, vector<64x256xf32>, vector<32x256xf32> -> vector<32x256xf32>
    %c0_45 = arith.constant 0 : index
    %c0_46 = arith.constant 0 : index
    %96 = vector.load %arg10[%c0_45, %c0_46] : memref<32x1xf32, #tpu.memory_space<vmem>>, vector<32x1xf32>
    %97 = vector.broadcast %96 : vector<32x1xf32> to vector<32x256xf32>
    %98 = arith.addf %95, %97 : vector<32x256xf32>
    %cst_47 = arith.constant 0.000000e+00 : f32
    %99 = vector.broadcast %cst_47 : f32 to vector<32x256xf32>
    %100 = arith.maximumf %98, %99 : vector<32x256xf32>
    %c0_48 = arith.constant 0 : index
    %c0_49 = arith.constant 0 : index
    %c0_50 = arith.constant 0 : index
    %101 = vector.load %arg11[%c0_48, %c0_49, %c0_50] : memref<1x32x256xf32, #tpu.memory_space<vmem>>, vector<1x32x256xf32>
    %102 = vector.shape_cast %101 : vector<1x32x256xf32> to vector<32x256xf32>
    %103 = vector.shape_cast %100 : vector<32x256xf32> to vector<1x32x256xf32>
    tpu.vector_store %arg11[%c0_48, %c0_49, %c0_50], %103 {strides = array<i32>} : memref<1x32x256xf32, #tpu.memory_space<vmem>>, vector<1x32x256xf32>,
    return
  }
  func.func @transform_0(%arg0: i32, %arg1: i32) -> (i32, i32, i32) {
    %c0_i32 = arith.constant 0 : i32
    %c0_i32_0 = arith.constant 0 : i32
    return %arg0, %c0_i32, %arg1 : i32, i32, i32
  }
  func.func @transform_1(%arg0: i32, %arg1: i32) -> (i32, i32, i32) {
    %c0_i32 = arith.constant 0 : i32
    %c0_i32_0 = arith.constant 0 : i32
    %c0_i32_1 = arith.constant 0 : i32
    return %arg0, %c0_i32, %c0_i32_0 : i32, i32, i32
  }
  func.func @transform_2(%arg0: i32, %arg1: i32) -> (i32, i32, i32) {
    %c0_i32 = arith.constant 0 : i32
    %c0_i32_0 = arith.constant 0 : i32
    %c0_i32_1 = arith.constant 0 : i32
    return %arg0, %c0_i32, %c0_i32_0 : i32, i32, i32
  }
  func.func @transform_3(%arg0: i32, %arg1: i32) -> (i32, i32, i32) {
    %c0_i32 = arith.constant 0 : i32
    %c0_i32_0 = arith.constant 0 : i32
    %c0_i32_1 = arith.constant 0 : i32
    return %arg0, %c0_i32, %c0_i32_0 : i32, i32, i32
  }
  func.func @transform_4(%arg0: i32, %arg1: i32) -> (i32, i32, i32) {
    %c0_i32 = arith.constant 0 : i32
    %c0_i32_0 = arith.constant 0 : i32
    return %arg0, %c0_i32, %arg1 : i32, i32, i32
  }
  func.func @transform_5(%arg0: i32, %arg1: i32) -> (i32, i32) {
    %c0_i32 = arith.constant 0 : i32
    %c0_i32_0 = arith.constant 0 : i32
    %c0_i32_1 = arith.constant 0 : i32
    return %c0_i32, %c0_i32_0 : i32, i32
  }
  func.func @transform_6(%arg0: i32, %arg1: i32) -> (i32, i32) {
    %c0_i32 = arith.constant 0 : i32
    %c0_i32_0 = arith.constant 0 : i32
    %c0_i32_1 = arith.constant 0 : i32
    return %c0_i32, %c0_i32_0 : i32, i32
  }
  func.func @transform_7(%arg0: i32, %arg1: i32) -> (i32, i32) {
    %c0_i32 = arith.constant 0 : i32
    %c0_i32_0 = arith.constant 0 : i32
    %c0_i32_1 = arith.constant 0 : i32
    return %c0_i32, %c0_i32_0 : i32, i32
  }
  func.func @transform_8(%arg0: i32, %arg1: i32) -> (i32, i32) {
    %c0_i32 = arith.constant 0 : i32
    %c0_i32_0 = arith.constant 0 : i32
    %c0_i32_1 = arith.constant 0 : i32
    return %c0_i32, %c0_i32_0 : i32, i32
  }
  func.func @transform_9(%arg0: i32, %arg1: i32) -> (i32, i32, i32) {
    %c0_i32 = arith.constant 0 : i32
    %c0_i32_0 = arith.constant 0 : i32
    return %arg0, %c0_i32, %arg1 : i32, i32, i32
  }
}

</mosaic_0001>

<bundles_post_ra>
// kernel: tpu_custom_call.1
= control target key start
LH: loop header
LB: loop body
LE: loop exit
PB: predicated region body
PF: predicated region fallthrough
CT: control target
= control target key end

     0   :  { %14 = vsyncpa [#allocation3], 0  ;;  %s3188_s0 = inlined_call_operand.vmem [shape: f32[2,3,256], index: 0, kind: input, shape index: {}]   ;;  %s3189_s1 = inlined_call_operand.vmem [shape: f32[2,64,3], index: 1, kind: input, shape index: {}]   ;;  %s3190_s2 = inlined_call_operand.vmem [shape: f32[2,64,1], index: 2, kind: input, shape index: {}]   ;;  %s3191_s3 = inlined_call_operand.vmem [shape: f32[2,64,64], index: 3, kind: input, shape index: {}]   ;;  %s3192_s4 = inlined_call_operand.vmem [shape: f32[2,32,256], index: 4, kind: input, shape index: {}]   ;;  %s3193_s5 = inlined_call_operand.vmem [shape: f32[64,32], index: 5, kind: input, shape index: {}]   ;;  %s3194_s6 = inlined_call_operand.vmem [shape: f32[64,1], index: 6, kind: input, shape index: {}]   ;;  %s3195_s7 = inlined_call_operand.vmem [shape: f32[32,64], index: 7, kind: input, shape index: {}]   ;;  %s3196_s8 = inlined_call_operand.vmem [shape: f32[32,1], index: 8, kind: input, shape index: {}]   ;;  %s3197_s9 = inlined_call_operand.hbm [shape: f32[2,32,256], index: 9, kind: output, shape index: {}]  }
   0x1   :  { %16 = vsyncpa [#allocation3 + $0x1], 0  ;;  %s2177_s30 = smov 0   ;;  %s2179_s10 = smov 0  }
   0x2   :  { %s2181_s11 = smov 0   ;;  %s2183_s12 = smov 0  }
   0x3   :  { %s2185_s13 = smov 0   ;;  %s2187_s14 = smov 0  }
   0x4 LB: > { %s1909_s15 = sadd.s32 4294967295, %s2120_s14   ;;  %s1910_s16 = sadd.s32 4294967294, %s2120_s14   ;;  %s2120_s14 = sphi %s2187_s14, %s22_s14   ;;  %s2116_s13 = sphi %s2185_s13, %s3220_s13   ;;  %s2112_s12 = sphi %s2183_s12, %s3219_s12   ;;  %s2108_s11 = sphi %s2181_s11, %s3218_s11   ;;  %s2104_s10 = sphi %s2179_s10, %s3217_s10   ;;  %s2100_s30 = sphi %s2177_s30, %s3216_s30  }
   0x5   : > { %s34_s17 = sadd.s32 1, %s2116_s13  ;;  %s261_s18 = sadd.s32 1, %s2108_s11 }
   0x6   : > { %p36_p0 = scmp.ge.s32.totalorder %s34_s17, 2  ;;  %p271_p1 = scmp.ne.s32.totalorder %s2108_s11, %s2104_s10 }
   0x7   : > { %p272_p2 = scmp.eq.s32.totalorder %s1909_s15, 1  ;;  %p277_p3 = scmp.ne.s32.totalorder %s2104_s10, %s2100_s30 }
   0x8   : > { %s3222_s17 = smov (%p36_p0, %s34_s17), 0  ;;  %p278_p5 = scmp.eq.s32.totalorder %s1910_s16, 1 }
   0x9   : > { %3201 = sst [smem:[#allocation5_spill]] %s3222_s17  ;;  %p2217_p4 = por %p272_p2, %p271_p1 }
   0xa   : > { %s256_s20 = ssub.s32 %s2116_s13, %s3222_s17  ;;  %p1913_p6 = scmp.ge.s32.totalorder %s2120_s14, 1 }
   0xb   : > { %p259_p7 = scmp.eq.s32.totalorder %s256_s20, 0  ;;  %p2224_p8 = por %p278_p5, %p277_p3 }
   0xc   : > { %p358_p9 = scmp.lt.s32.totalorder %s2120_s14, 3 }
   0xd   : > { %s2230_s22 = scalar_select %p259_p7, %s2108_s11, %s261_s18  }
   0xe   : > { %p359_p10 = pnand %p1913_p6, %p358_p9 }
  0x10   : > { %362 = sbr.rel (%p359_p10) target bundleno = 901 (0x385), region = 56 }
  0x15   : > { %p423_p11 = scmp.lt.s32.totalorder %s2112_s12, 1  ;;  %v3199_v0 = vmov 0.0   ;;  %v2123_v1 = vmov 0   ;;  %vm495_vm0 = vcmask 1042432   ;;  %vm512_vm1 = vcmask 23552   ;;  %v1541_v20 = vld [vmem:[%s3194_s6 + $0x30] sm:$0xff] }
  0x16   : > { %605 = vmatprep.mubr.f32.mxu0 %v3199_v0  ;;  %2026 = vset.pattern.permute.xlu1 %v2123_v1  ;;  %v1542_v22 = vld [vmem:[%s3194_s6 + $0x38] sm:$0xff]  ;;  %v1539_v23 = vld [vmem:[%s3194_s6 + $0x20] sm:$0xff]  ;;  %v1540_v25 = vld [vmem:[%s3194_s6 + $0x28] sm:$0xff]  ;;  %s2124_s15 = smov [#allocation2]  }
  0x17   : > { %s424_s23 = scalar_select %p423_p11, %s2112_s12, 1  ;;  %2025 = vset.pattern.permute.xlu0 %v2123_v1  ;;  %1308 = vmatprep.mubr.f32.mxu1 %v3199_v0  ;;  %v1537_v26 = vld [vmem:[%s3194_s6 + $0x10] sm:$0xff]  ;;  %v1538_v28 = vld [vmem:[%s3194_s6 + $0x18] sm:$0xff]  ;;  %v1535_v29 = vld [vmem:[%s3194_s6] sm:$0xff] }
  0x18   : > { %v1536_v31 = vld [vmem:[%s3194_s6 + $0x8] sm:$0xff]  ;;  %v1619_v33 = vld [vmem:[%s3196_s8] sm:$0xff]  ;;  %v1622_v34 = vld [vmem:[%s3196_s8 + $0x18] sm:$0xff]  ;;  %s2048_s18 = sshll.u32 %s2124_s15, 4  ;;  %s2049_s18 = int_to_ptr.vmem [resolvable:$false] %s2048_s18 }
  0x19   : > { %s1960_s24 = sshll.u32 %s424_s23, 3  ;;  %s2236_s25 = sshll.u32 %s424_s23, 6  ;;  %v1620_v32 = vld [vmem:[%s3196_s8 + $0x8] sm:$0xff]  ;;  %v1621_v35 = vld [vmem:[%s3196_s8 + $0x10] sm:$0xff] }
  0x1a   : > { %s430_s28 = scalar_lea.vmem %s3188_s0, %s1960_s24  ;;  %s2245_s16 = scalar_lea.vmem %s3189_s1, %s2236_s25 }
  0x1b   : > { %s2251_s17 = scalar_lea.vmem %s3190_s2, %s2236_s25  ;;  %v458_v2 = vld [vmem:[%s430_s28] sm:$0x77]  ;;  %v460_v12 = vld [vmem:[%s2245_s16 + $0x8] sm:$0xff]  ;;  %v461_v15 = vld [vmem:[%s2245_s16 + $0x10] sm:$0xff]  ;;  %s2431_s28 = scalar_lea.vmem %s3192_s4, %s2236_s25 }
  0x1c   : > { %v491_v3 = vmul.f32 %v458_v2, %v458_v2  ;;  %v511_v4 = vcombine.high %v458_v2, %v458_v2  ;;  %v459_v5 = vld [vmem:[%s2245_s16] sm:$0xff]  ;;  %v469_v8 = vld [vmem:[%s2251_s17 + $0x10] sm:$0xff]  ;;  %v470_v11 = vld [vmem:[%s2251_s17 + $0x18] sm:$0xff]  ;;  %s446_s26 = scalar_lea.vmem %s3191_s3, %s2236_s25  ;;  %s2050_s20 = scalar_lea.vmem %s2049_s18, 2048 }
  0x1d   : > { %v467_v9 = vld [vmem:[%s2251_s17] sm:$0xff]  ;;  %666 = vperm.xlu1 %2026, %v469_v8   ;;  %v468_v13 = vld [vmem:[%s2251_s17 + $0x8] sm:$0xff]  ;;  %v474_v17 = vld [vmem:[%s2251_s17 + $0x38] sm:$0xff] }
  0x1e   : > { %v493_v6 = vcombine.high %v491_v3, %v491_v3  ;;  %v2254_v7 = vsel %vm495_vm0, %v491_v3, 0.0  ;;  %1925 = vmatprep.subr.msk.mxu0 %vm495_vm0, %v511_v4  ;;  %656 = vperm.xlu0 %2025, %v467_v9   ;;  %v472_v14 = vld [vmem:[%s2251_s17 + $0x28] sm:$0xff]  ;;  %v471_v16 = vld [vmem:[%s2251_s17 + $0x20] sm:$0xff]  ;;  %v462_v18 = vld [vmem:[%s2245_s16 + $0x18] sm:$0xff] }
  0x1f   : > { %1926 = vmatpush1.msk.msra.mxu0 %vm495_vm0, %v458_v2  ;;  %v473_v19 = vld [vmem:[%s2251_s17 + $0x30] sm:$0xff]  ;;  %v463_v21 = vld [vmem:[%s2245_s16 + $0x20] sm:$0xff]  ;;  %v464_v24 = vld [vmem:[%s2245_s16 + $0x28] sm:$0xff]  ;;  %v497_v36 = vrot.slane %v2254_v7, 4 }
  0x20   : > { %v2258_v10 = vsel %vm495_vm0, %v493_v6, 0.0  ;;  %1927 = vmatmul.mubr.msk.f32.vlgmr.msra.gmra.mxu0 %vm512_vm1, %v459_v5  ;;  %v465_v27 = vld [vmem:[%s2245_s16 + $0x30] sm:$0xff]  ;;  %v466_v30 = vld [vmem:[%s2245_s16 + $0x38] sm:$0xff]  ;;  %s419_s16 = sand.u32 1, %s2104_s10  }
  0x21   : > { %611 = vmatprep.mubr.f32.mxu0 %v3199_v0  ;;  %671 = vperm.xlu1 %2026, %v470_v11   ;;  %v504_v37 = vrot.slane %v2258_v10, 4  ;;  %v498_v38 = vadd.f32 %v497_v36, %v2254_v7  ;;  %s1914_s23 = sshll.u32 %s419_s16, 6 }
  0x22   : > { %661 = vperm.xlu0 %2025, %v468_v13   ;;  %s3122_s24 = scalar_lea.vmem [#allocation2], %s1914_s23 }
  0x23   : > { %v505_v39 = vadd.f32 %v504_v37, %v2258_v10  ;;  %v499_v42 = vrot.slane %v498_v38, 2  ;;  %s1776_s25 = sshll.u32 %s3122_s24, 4  ;;  %s3137_s25 = int_to_ptr.vmem [resolvable:$true] %s1776_s25 }
  0x24   : > { %1928 = vmatmul.mubr.msk.f32.gmra.mxu0 %vm512_vm1, %v460_v12  ;;  %s2044_s29 = scalar_lea.vmem %s3137_s25, 1024  ;;  %p2051_p1 = scmp.lt.s32.totalorder %s3137_s25, %s2049_s18 }
  0x25   : > { %617 = vmatprep.mubr.f32.mxu0 %v3199_v0  ;;  %681 = vperm.xlu1 %2026, %v472_v14   ;;  %v506_v43 = vrot.slane %v505_v39, 2  ;;  %v500_v48 = vadd.f32 %v499_v42, %v498_v38  ;;  %p2045_p12 = scmp.ne.s32.totalorder %s3137_s25, %s2044_s29  ;;  %p2052_p2 = scmp.lt.s32.totalorder %s2050_s20, %s2044_s29 }
  0x26   : > { %676 = vperm.xlu0 %2025, %v471_v16  }
  0x27   : > { %v507_v49 = vadd.f32 %v506_v43, %v505_v39  ;;  %v501_v53 = vrot.slane %v500_v48, 1  ;;  %p2046_p13 = pnand %p2045_p12, %p2217_p4  ;;  %p2053_p3 = por %p2052_p2, %p2051_p1 }
  0x28   : > { %1929 = vmatmul.mubr.msk.f32.gmra.mxu0 %vm512_vm1, %v461_v15 }
  0x29   : > { %623 = vmatprep.mubr.f32.mxu0 %v3199_v0  ;;  %691 = vperm.xlu1 %2026, %v474_v17   ;;  %v508_v54 = vrot.slane %v507_v49, 1  ;;  %v502_v58 = vadd.f32 %v501_v53, %v500_v48  ;;  %p2047_p0 = pneg %p2046_p13 }
  0x2a   : > { %686 = vperm.xlu0 %2025, %v473_v19  }
  0x2b   : > { %v509_v59 = vadd.f32 %v508_v54, %v507_v49  ;;  %p2054_p5 = pnand %p2053_p3, %p2047_p0 }
  0x2c   : > { %1930 = vmatmul.mubr.msk.f32.gmra.mxu0 %vm512_vm1, %v462_v18 }
  0x2d   : > { %629 = vmatprep.mubr.f32.mxu0 %v3199_v0  ;;  %1575 = vperm.xlu1 %2026, %v1541_v20  }
  0x2e   : > { %1580 = vperm.xlu0 %2025, %v1542_v22  }
  0x30   : > { %1931 = vmatmul.mubr.msk.f32.gmra.mxu0 %vm512_vm1, %v463_v21 }
  0x31   : > { %635 = vmatprep.mubr.f32.mxu0 %v3199_v0  ;;  %1565 = vperm.xlu1 %2026, %v1539_v23  }
  0x32   : > { %1570 = vperm.xlu0 %2025, %v1540_v25  }
  0x34   : > { %1932 = vmatmul.mubr.msk.f32.gmra.mxu0 %vm512_vm1, %v464_v24 }
  0x35   : > { %641 = vmatprep.mubr.f32.mxu0 %v3199_v0  ;;  %1555 = vperm.xlu1 %2026, %v1537_v26  }
  0x36   : > { %1560 = vperm.xlu0 %2025, %v1538_v28  }
  0x38   : > { %1933 = vmatmul.mubr.msk.f32.gmra.mxu0 %vm512_vm1, %v465_v27 }
  0x39   : > { %647 = vmatprep.mubr.f32.mxu0 %v3199_v0  ;;  %1545 = vperm.xlu1 %2026, %v1535_v29  }
  0x3a   : > { %1550 = vperm.xlu0 %2025, %v1536_v31  }
  0x3c   : > { %1934 = vmatmul.mubr.msk.f32.gmra.mxu0 %vm512_vm1, %v466_v30 }
  0x3d   : > { %1470 = vmatprep.mubr.f32.mxu0 %v3199_v0  ;;  %1630 = vperm.xlu1 %2026, %v1620_v32  }
  0x3e   : > { %1625 = vperm.xlu0 %2025, %v1619_v33  }
  0x41   : > { %1640 = vperm.xlu1 %2026, %v1622_v34  }
  0x42   : > { %1635 = vperm.xlu0 %2025, %v1621_v35  }
  0x98   : > { %v667_v44 = vpop.permute.xlu1 %666 }
  0x99   : > { %v657_v46 = vpop.permute.xlu0 %656  ;;  %v698_v62 = vadd.f32 %v667_v44, %v502_v58  ;;  %v699_v2 = vadd.f32 %v667_v44, %v509_v59 }
  0x9a   : > { %v694_v3 = vadd.f32 %v657_v46, %v502_v58  ;;  %v695_v4 = vadd.f32 %v657_v46, %v509_v59 }
  0x9c   : > { %v672_v51 = vpop.permute.xlu1 %671 }
  0x9d   : > { %v662_v55 = vpop.permute.xlu0 %661  ;;  %v700_v5 = vadd.f32 %v672_v51, %v502_v58  ;;  %v701_v6 = vadd.f32 %v672_v51, %v509_v59 }
  0x9e   : > { %v696_v7 = vadd.f32 %v662_v55, %v502_v58  ;;  %v697_v8 = vadd.f32 %v662_v55, %v509_v59 }
  0xa0   : > { %v682_v60 = vpop.permute.xlu1 %681 }
  0xa1   : > { %v677_v63 = vpop.permute.xlu0 %676  ;;  %v704_v11 = vadd.f32 %v682_v60, %v502_v58  ;;  %v705_v12 = vadd.f32 %v682_v60, %v509_v59 }
  0xa2   : > { %v702_v13 = vadd.f32 %v677_v63, %v502_v58  ;;  %v703_v21 = vadd.f32 %v677_v63, %v509_v59 }
  0xa4   : > { %v692_v15 = vpop.permute.xlu1 %691 }
  0xa5   : > { %v708_v22 = vadd.f32 %v692_v15, %v502_v58  ;;  %v687_v25 = vpop.permute.xlu0 %686  ;;  %v709_v53 = vadd.f32 %v692_v15, %v509_v59 }
  0xa6   : > { %v706_v31 = vadd.f32 %v687_v25, %v502_v58 }
  0xe0   : > { %v607_v40 = vpop.f32.mrf.mxu0 }
  0xe1   : > { %v710_v16 = vmul.f32 2.0, %v607_v40  ;;  %v707_v40 = vadd.f32 %v687_v25, %v509_v59 }
  0xe2   : > { %v609_v41 = vpop.f32.mrf.mxu0 }
  0xe3   : > { %v711_v26 = vmul.f32 2.0, %v609_v41  ;;  %v2333_v35 = vsub.f32 %v694_v3, %v710_v16 }
  0xe4   : > { %v613_v45 = vpop.f32.mrf.mxu0 }
  0xe5   : > { %v712_v23 = vmul.f32 2.0, %v613_v45  ;;  %v2345_v44 = vsub.f32 %v695_v4, %v711_v26 }
  0xe6   : > { %v615_v47 = vpop.f32.mrf.mxu0 }
  0xe7   : > { %v713_v27 = vmul.f32 2.0, %v615_v47  ;;  %v2341_v41 = vsub.f32 %v696_v7, %v712_v23 }
  0xe8   : > { %v619_v50 = vpop.f32.mrf.mxu0 }
  0xe9   : > { %v714_v9 = vmul.f32 2.0, %v619_v50  ;;  %v2347_v45 = vsub.f32 %v697_v8, %v713_v27 }
  0xea   : > { %v621_v52 = vpop.f32.mrf.mxu0 }
  0xeb   : > { %v715_v17 = vmul.f32 2.0, %v621_v52  ;;  %v2329_v28 = vsub.f32 %v698_v62, %v714_v9  ;;  %v742_v9 = vlaneseq }
  0xec   : > { %v625_v56 = vpop.f32.mrf.mxu0 }
  0xed   : > { %v716_v14 = vmul.f32 2.0, %v625_v56  ;;  %v2335_v36 = vsub.f32 %v699_v2, %v715_v17  ;;  %v751_v46 = vmin.f32 %v2333_v35, %v2329_v28 }
  0xee   : > { %v627_v57 = vpop.f32.mrf.mxu0 }
  0xef   : > { %v717_v18 = vmul.f32 2.0, %v627_v57  ;;  %v2331_v32 = vsub.f32 %v700_v5, %v716_v14  ;;  %v764_v54 = vmin.f32 %v2345_v44, %v2335_v36  ;;  %v2377_v14 = vshrl.u32 %v742_v9, 7 }
  0xf0   : > { %v631_v61 = vpop.f32.mrf.mxu0 }
  0xf1   : > { %v718_v19 = vmul.f32 2.0, %v631_v61  ;;  %v2337_v37 = vsub.f32 %v701_v6, %v717_v18  ;;  %v752_v49 = vmin.f32 %v2341_v41, %v2331_v32  ;;  %v2389_v23 = vadd.s32 32, %v2377_v14 }
  0xf2   : > { %v633_v1 = vpop.f32.mrf.mxu0  ;;  %v2395_v25 = vadd.s32 48, %v2377_v14  ;;  %v2402_v27 = vadd.s32 56, %v2377_v14 }
  0xf3   : > { %v719_v29 = vmul.f32 2.0, %v633_v1  ;;  %v2339_v38 = vsub.f32 %v702_v13, %v718_v19  ;;  %v765_v55 = vmin.f32 %v2347_v45, %v2337_v37  ;;  %v2380_v19 = vadd.s32 8, %v2377_v14 }
  0xf4   : > { %v637_v10 = vpop.f32.mrf.mxu0 }
  0xf5   : > { %v720_v24 = vmul.f32 2.0, %v637_v10  ;;  %v2351_v47 = vsub.f32 %v703_v21, %v719_v29  ;;  %v753_v56 = vmin.f32 %v751_v46, %v2339_v38  ;;  %v2386_v21 = vadd.s32 24, %v2377_v14 }
  0xf6   : > { %v639_v20 = vpop.f32.mrf.mxu0 }
  0xf7   : > { %v721_v33 = vmul.f32 2.0, %v639_v20  ;;  %v2343_v42 = vsub.f32 %v704_v11, %v720_v24  ;;  %v766_v63 = vmin.f32 %v764_v54, %v2351_v47  ;;  %v2383_v20 = vadd.s32 16, %v2377_v14 }
  0xf8   : > { %v643_v30 = vpop.f32.mrf.mxu0  ;;  %v2392_v24 = vadd.s32 40, %v2377_v14 }
  0xf9   : > { %v722_v34 = vmul.f32 2.0, %v643_v30  ;;  %v2355_v50 = vsub.f32 %v705_v12, %v721_v33  ;;  %v754_v58 = vmin.f32 %v752_v49, %v2343_v42 }
  0xfa   : > { %v645_v39 = vpop.f32.mrf.mxu0 }
  0xfb   : > { %v723_v43 = vmul.f32 2.0, %v645_v39  ;;  %v2357_v51 = vsub.f32 %v706_v31, %v722_v34  ;;  %v767_v59 = vmin.f32 %v765_v55, %v2355_v50 }
  0xfc   : > { %v649_v48 = vpop.f32.mrf.mxu0 }
  0xfd   : > { %v724_v52 = vmul.f32 2.0, %v649_v48  ;;  %v2365_v60 = vsub.f32 %v707_v40, %v723_v43  ;;  %v755_v1 = vmin.f32 %v753_v56, %v2357_v51 }
  0xfe   : > { %v651_v57 = vpop.f32.mrf.mxu0 }
  0xff   : > { %v2367_v61 = vsub.f32 %v708_v22, %v724_v52  ;;  %v725_v62 = vmul.f32 2.0, %v651_v57  ;;  %v768_v4 = vmin.f32 %v766_v63, %v2365_v60 }
 0x101   : > { %v756_v2 = vmin.f32 %v754_v58, %v2367_v61  ;;  %v2373_v3 = vsub.f32 %v709_v53, %v725_v62 }
 0x103   : > { %v757_v5 = vmin.f32 %v755_v1, %v756_v2  ;;  %v769_v6 = vmin.f32 %v767_v59, %v2373_v3 }
 0x105   : > { %v758_v7 = vrot.slane %v757_v5, 4  ;;  %v770_v8 = vmin.f32 %v768_v4, %v769_v6 }
 0x107   : > { %v759_v10 = vmin.f32 %v757_v5, %v758_v7  ;;  %v771_v11 = vrot.slane %v770_v8, 4 }
 0x109   : > { %v760_v12 = vrot.slane %v759_v10, 2  ;;  %v772_v13 = vmin.f32 %v770_v8, %v771_v11 }
 0x10b   : > { %v761_v15 = vmin.f32 %v759_v10, %v760_v12  ;;  %v773_v16 = vrot.slane %v772_v13, 2 }
 0x10d   : > { %v762_v17 = vrot.slane %v761_v15, 1  ;;  %v774_v18 = vmin.f32 %v772_v13, %v773_v16  ;;  %v490_v13 = vld [vmem:[%s2431_s28 + $0x38] sm:$0xff]  ;;  %v489_v16 = vld [vmem:[%s2431_s28 + $0x30] sm:$0xff] }
 0x10e   : > { %1430 = vmatprep.subr.mxu0 %v490_v13 }
 0x10f   : > { %v763_v22 = vmin.f32 %v761_v15, %v762_v17  ;;  %v775_v26 = vrot.slane %v774_v18, 1  ;;  %1431 = vmatpush1.msra.mxu0 %v489_v16 }
 0x111   : > { %vm777_vm2 = vcmp.eq.f32.partialorder %v2333_v35, %v763_v22  ;;  %vm779_vm3 = vcmp.eq.f32.partialorder %v2341_v41, %v763_v22  ;;  %vm781_vm4 = vcmp.eq.f32.partialorder %v2329_v28, %v763_v22  ;;  %vm783_vm5 = vcmp.eq.f32.partialorder %v2331_v32, %v763_v22 }
 0x112   : > { %vm785_vm6 = vcmp.eq.f32.partialorder %v2339_v38, %v763_v22  ;;  %vm787_vm7 = vcmp.eq.f32.partialorder %v2343_v42, %v763_v22  ;;  %vm789_vm8 = vcmp.eq.f32.partialorder %v2357_v51, %v763_v22  ;;  %v793_v29 = vsel %vm777_vm2, %v2377_v14, 64 }
 0x113   : > { %v795_v30 = vsel %vm779_vm3, %v2380_v19, 64  ;;  %v797_v31 = vsel %vm781_vm4, %v2383_v20, 64  ;;  %v799_v33 = vsel %vm783_vm5, %v2386_v21, 64  ;;  %vm791_vm9 = vcmp.eq.f32.partialorder %v2367_v61, %v763_v22 }
 0x114   : > { %v801_v34 = vsel %vm785_vm6, %v2389_v23, 64  ;;  %vm809_vm10 = vcmp.lt.s32.totalorder %v793_v29, %v797_v31  ;;  %vm811_vm11 = vcmp.lt.s32.totalorder %v795_v30, %v799_v33  ;;  %v776_v39 = vmin.f32 %v774_v18, %v775_v26 }
 0x115   : > { %v803_v40 = vsel %vm787_vm7, %v2392_v24, 64  ;;  %v805_v43 = vsel %vm789_vm8, %v2395_v25, 64  ;;  %v810_v46 = vsel %vm809_vm10, %v793_v29, %v797_v31  ;;  %v812_v48 = vsel %vm811_vm11, %v795_v30, %v799_v33 }
 0x116   : > { %v807_v49 = vsel %vm791_vm9, %v2402_v27, 64  ;;  %vm813_vm12 = vcmp.lt.s32.totalorder %v810_v46, %v801_v34  ;;  %vm815_vm13 = vcmp.lt.s32.totalorder %v812_v48, %v803_v40  ;;  %v871_v52 = vmax.f32 %v763_v22, 1e-10 }
 0x117   : > { %v814_v53 = vsel %vm813_vm12, %v810_v46, %v801_v34  ;;  %v816_v54 = vsel %vm815_vm13, %v812_v48, %v803_v40  ;;  %vm778_vm14 = vcmp.eq.f32.partialorder %v2345_v44, %v776_v39  ;;  %vm780_vm15 = vcmp.eq.f32.partialorder %v2347_v45, %v776_v39  ;;  %v488_v34 = vld [vmem:[%s2431_s28 + $0x28] sm:$0xff] }
 0x118   : > { %vm817_vm0 = vcmp.lt.s32.totalorder %v814_v53, %v805_v43  ;;  %vm819_vm1 = vcmp.lt.s32.totalorder %v816_v54, %v807_v49  ;;  %vm782_vm2 = vcmp.eq.f32.partialorder %v2335_v36, %v776_v39  ;;  %vm784_vm3 = vcmp.eq.f32.partialorder %v2337_v37, %v776_v39  ;;  %1432 = vmatprep.subr.mxu0 %v488_v34 }
 0x119   : > { %v818_v55 = vsel %vm817_vm0, %v814_v53, %v805_v43  ;;  %v820_v56 = vsel %vm819_vm1, %v816_v54, %v807_v49  ;;  %vm786_vm5 = vcmp.eq.f32.partialorder %v2351_v47, %v776_v39  ;;  %v794_v57 = vsel %vm778_vm14, %v2377_v14, 64  ;;  %v487_v43 = vld [vmem:[%s2431_s28 + $0x20] sm:$0xff]  ;;  %v486_v49 = vld [vmem:[%s2431_s28 + $0x18] sm:$0xff]  ;;  %v485_v53 = vld [vmem:[%s2431_s28 + $0x10] sm:$0xff] }
 0x11a   : > { %vm821_vm4 = vcmp.lt.s32.totalorder %v818_v55, %v820_v56  ;;  %v796_v58 = vsel %vm780_vm15, %v2380_v19, 64  ;;  %vm788_vm6 = vcmp.eq.f32.partialorder %v2355_v50, %v776_v39  ;;  %v798_v63 = vsel %vm782_vm2, %v2383_v20, 64  ;;  %1433 = vmatpush1.msra.mxu0 %v487_v43 }
 0x11b   : > { %v822_v62 = vsel %vm821_vm4, %v818_v55, %v820_v56  ;;  %v800_v59 = vsel %vm784_vm3, %v2386_v21, 64  ;;  %2028 = vrcp.f32 %v871_v52  ;;  %vm790_vm7 = vcmp.eq.f32.partialorder %v2365_v60, %v776_v39  ;;  %1434 = vmatprep.subr.mxu0 %v486_v49 }
 0x11c   : > { %v823_v1 = vrot.slane %v822_v62, 4  ;;  %vm792_vm8 = vcmp.eq.f32.partialorder %v2373_v3, %v776_v39  ;;  %v802_v2 = vsel %vm786_vm5, %v2389_v23, 64  ;;  %vm832_vm9 = vcmp.lt.s32.totalorder %v794_v57, %v798_v63  ;;  %1435 = vmatpush1.msra.mxu0 %v485_v53 }
 0x11d   : > { %vm834_vm10 = vcmp.lt.s32.totalorder %v796_v58, %v800_v59  ;;  %v804_v4 = vsel %vm788_vm6, %v2392_v24, 64  ;;  %v833_v5 = vsel %vm832_vm9, %v794_v57, %v798_v63  ;;  %v806_v8 = vsel %vm790_vm7, %v2395_v25, 64 }
 0x11e   : > { %vm824_vm11 = vcmp.lt.s32.totalorder %v822_v62, %v823_v1  ;;  %v835_v6 = vsel %vm834_vm10, %v796_v58, %v800_v59  ;;  %vm836_vm12 = vcmp.lt.s32.totalorder %v833_v5, %v802_v2  ;;  %v808_v10 = vsel %vm792_vm8, %v2402_v27, 64 }
 0x11f   : > { %v825_v7 = vsel %vm824_vm11, %v822_v62, %v823_v1  ;;  %vm838_vm13 = vcmp.lt.s32.totalorder %v835_v6, %v804_v4  ;;  %v837_v11 = vsel %vm836_vm12, %v833_v5, %v802_v2  ;;  %v872_v15 = vmax.f32 %v776_v39, 1e-10  ;;  %v483_v62 = vld [vmem:[%s2431_s28] sm:$0xff] }
 0x120   : > { %v826_v9 = vrot.slane %v825_v7, 2  ;;  %v839_v12 = vsel %vm838_vm13, %v835_v6, %v804_v4  ;;  %vm840_vm14 = vcmp.lt.s32.totalorder %v837_v11, %v806_v8 }
 0x121   : > { %vm842_vm15 = vcmp.lt.s32.totalorder %v839_v12, %v808_v10  ;;  %v841_v17 = vsel %vm840_vm14, %v837_v11, %v806_v8  ;;  %2030 = vrcp.f32 %v872_v15 }
 0x122   : > { %vm827_vm0 = vcmp.lt.s32.totalorder %v825_v7, %v826_v9  ;;  %v843_v18 = vsel %vm842_vm15, %v839_v12, %v808_v10 }
 0x123   : > { %v828_v22 = vsel %vm827_vm0, %v825_v7, %v826_v9  ;;  %vm844_vm1 = vcmp.lt.s32.totalorder %v841_v17, %v843_v18 }
 0x124   : > { %v829_v26 = vrot.slane %v828_v22, 1  ;;  %v845_v29 = vsel %vm844_vm1, %v841_v17, %v843_v18 }
 0x125   : > { %v846_v30 = vrot.slane %v845_v29, 4 }
 0x126   : > { %vm830_vm2 = vcmp.lt.s32.totalorder %v828_v22, %v829_v26 }
 0x127   : > { %v831_v31 = vsel %vm830_vm2, %v828_v22, %v829_v26  ;;  %vm847_vm3 = vcmp.lt.s32.totalorder %v845_v29, %v846_v30 }
 0x128   : > { %v848_v33 = vsel %vm847_vm3, %v845_v29, %v846_v30  ;;  %vm855_vm4 = vcmp.eq.s32.totalorder %v2377_v14, %v831_v31  ;;  %vm857_vm5 = vcmp.eq.s32.totalorder %v2380_v19, %v831_v31  ;;  %vm859_vm6 = vcmp.eq.s32.totalorder %v2383_v20, %v831_v31  ;;  %v2444_v39 = vpop.eup %2028  ;;  %v1373_v30 = vld [vmem:[%s3193_s5] sm:$0xff] }
 0x129   : > { %v849_v40 = vrot.slane %v848_v33, 2  ;;  %vm861_vm7 = vcmp.eq.s32.totalorder %v2386_v21, %v831_v31  ;;  %vm863_vm8 = vcmp.eq.s32.totalorder %v2389_v23, %v831_v31  ;;  %vm865_vm9 = vcmp.eq.s32.totalorder %v2392_v24, %v831_v31 }
 0x12a   : > { %vm867_vm10 = vcmp.eq.s32.totalorder %v2395_v25, %v831_v31  ;;  %vm869_vm11 = vcmp.eq.s32.totalorder %v2402_v27, %v831_v31  ;;  %v2455_v46 = vsel %vm855_vm4, 1e+30, %v2333_v35  ;;  %v2460_v48 = vsel %vm857_vm5, 1e+30, %v2341_v41 }
 0x12b   : > { %vm850_vm12 = vcmp.lt.s32.totalorder %v848_v33, %v849_v40  ;;  %v2466_v52 = vsel %vm869_vm11, %v2444_v39, 0.0  ;;  %v2471_v35 = vsel %vm859_vm6, 1e+30, %v2329_v28  ;;  %v2476_v41 = vsel %vm861_vm7, 1e+30, %v2331_v32 }
 0x12c   : > { %v851_v54 = vsel %vm850_vm12, %v848_v33, %v849_v40  ;;  %v2482_v55 = vsel %vm863_vm8, 1e+30, %v2339_v38  ;;  %v2487_v56 = vsel %vm865_vm9, 1e+30, %v2343_v42  ;;  %v2492_v32 = vsel %vm867_vm10, 1e+30, %v2357_v51 }
 0x12d   : > { %v852_v28 = vrot.slane %v851_v54, 1  ;;  %v911_v57 = vmin.f32 %v2455_v46, %v2471_v35  ;;  %v912_v58 = vmin.f32 %v2460_v48, %v2476_v41  ;;  %v484_v38 = vld [vmem:[%s2431_s28 + $0x8] sm:$0xff]  ;;  %v2503_v42 = vsel %vm867_vm10, %v2444_v39, 0.0 }
 0x12e   : > { %v2508_v63 = vsel %vm865_vm9, %v2444_v39, 0.0  ;;  %v2513_v51 = vsel %vm863_vm8, %v2444_v39, 0.0  ;;  %v2518_v59 = vsel %vm861_vm7, %v2444_v39, 0.0  ;;  %1436 = vmatprep.subr.mxu0 %v484_v38  ;;  %v2523_v1 = vsel %vm869_vm11, 1e+30, %v2367_v61  ;;  %v2546_v8 = vpop.eup %2030 }
 0x12f   : > { %vm853_vm13 = vcmp.lt.s32.totalorder %v851_v54, %v852_v28  ;;  %v913_v2 = vmin.f32 %v911_v57, %v2482_v55  ;;  %v2529_v4 = vsel %vm859_vm6, %v2444_v39, 0.0  ;;  %1437 = vmatpush1.msra.mxu0 %v483_v62  ;;  %v914_v6 = vmin.f32 %v912_v58, %v2487_v56 }
 0x130   : > { %3204 = vst [vmem:[#allocation6_spill] sm:$0xff] %v2529_v4  ;;  %v854_v5 = vsel %vm853_vm13, %v851_v54, %v852_v28  ;;  %v2535_v7 = vsel %vm857_vm5, %v2444_v39, 0.0  ;;  %v2540_v61 = vsel %vm855_vm4, %v2444_v39, 0.0  ;;  %vm1381_vm4 = vcmask 261120   ;;  %v1374_v28 = vld [vmem:[%s3193_s5 + $0x8] sm:$0xff] }
 0x131   : > { %3205 = vst [vmem:[#allocation7_spill] sm:$0xff] %v2535_v7  ;;  %3206 = vst [vmem:[#allocation8_spill] sm:$0xff] %v2540_v61  ;;  %vm856_vm14 = vcmp.eq.s32.totalorder %v2377_v14, %v854_v5  ;;  %vm858_vm15 = vcmp.eq.s32.totalorder %v2380_v19, %v854_v5  ;;  %vm860_vm0 = vcmp.eq.s32.totalorder %v2383_v20, %v854_v5  ;;  %1943 = vmatmul.mubr.msk.f32.vlgmr.msra.gmra.mxu0 %vm1381_vm4, %v1373_v30  ;;  %v3209_v61 = vmov 0.0  }
 0x132   : > { %vm862_vm1 = vcmp.eq.s32.totalorder %v2386_v21, %v854_v5  ;;  %vm864_vm2 = vcmp.eq.s32.totalorder %v2389_v23, %v854_v5  ;;  %vm866_vm3 = vcmp.eq.s32.totalorder %v2392_v24, %v854_v5  ;;  %vm868_vm5 = vcmp.eq.s32.totalorder %v2395_v25, %v854_v5  ;;  %1476 = vmatprep.mubr.f32.mxu0 %v3199_v0 }
 0x133   : > { %vm870_vm6 = vcmp.eq.s32.totalorder %v2402_v27, %v854_v5  ;;  %v2560_v10 = vsel %vm856_vm14, 1e+30, %v2345_v44  ;;  %v2565_v11 = vsel %vm858_vm15, 1e+30, %v2347_v45  ;;  %v915_v12 = vmin.f32 %v913_v2, %v2492_v32 }
 0x134   : > { %v2555_v9 = vsel %vm870_vm6, %v2546_v8, 0.0  ;;  %v2571_v13 = vsel %vm860_vm0, 1e+30, %v2335_v36  ;;  %v2576_v15 = vsel %vm862_vm1, 1e+30, %v2337_v37  ;;  %v916_v44 = vmin.f32 %v914_v6, %v2523_v1 }
 0x135   : > { %v2582_v16 = vsel %vm864_vm2, 1e+30, %v2351_v47  ;;  %v2587_v45 = vsel %vm866_vm3, 1e+30, %v2355_v50  ;;  %v2590_v36 = vsel %vm868_vm5, 1e+30, %v2365_v60  ;;  %v924_v17 = vmin.f32 %v2560_v10, %v2571_v13  ;;  %1944 = vmatmul.mubr.msk.f32.gmra.mxu0 %vm1381_vm4, %v1374_v28 }
 0x136   : > { %v925_v37 = vmin.f32 %v2565_v11, %v2576_v15  ;;  %v917_v18 = vmin.f32 %v915_v12, %v916_v44  ;;  %v2597_v22 = vsel %vm868_vm5, %v2546_v8, 0.0  ;;  %v2602_v47 = vsel %vm866_vm3, %v2546_v8, 0.0  ;;  %1482 = vmatprep.mubr.f32.mxu0 %v3199_v0  ;;  %v1376_v44 = vld [vmem:[%s3193_s5 + $0x18] sm:$0xff] }
 0x137   : > { %v926_v50 = vmin.f32 %v924_v17, %v2582_v16  ;;  %v2608_v60 = vsel %vm864_vm2, %v2546_v8, 0.0  ;;  %v2613_v26 = vsel %vm862_vm1, %v2546_v8, 0.0  ;;  %v2618_v29 = vsel %vm860_vm0, %v2546_v8, 0.0 }
 0x138   : > { %v927_v31 = vmin.f32 %v925_v37, %v2587_v45  ;;  %v918_v33 = vrot.slane %v917_v18, 4  ;;  %v2627_v34 = vsel %vm858_vm15, %v2546_v8, 0.0  ;;  %v2632_v40 = vsel %vm856_vm14, %v2546_v8, 0.0 }
 0x139   : > { %3207 = vst [vmem:[#allocation9_spill] sm:$0xff] %v2627_v34  ;;  %3208 = vst [vmem:[#allocation10_spill] sm:$0xff] %v2632_v40  ;;  %v2637_v43 = vsel %vm870_vm6, 1e+30, %v2373_v3  ;;  %v928_v49 = vmin.f32 %v926_v50, %v2590_v36  ;;  %v1375_v3 = vld [vmem:[%s3193_s5 + $0x10] sm:$0xff] }
 0x13a   : > { %v929_v53 = vmin.f32 %v927_v31, %v2637_v43  ;;  %v919_v54 = vmin.f32 %v917_v18, %v918_v33  ;;  %1945 = vmatmul.mubr.msk.f32.gmra.mxu0 %vm1381_vm4, %v1375_v3  ;;  %v1379_v40 = vld [vmem:[%s3193_s5 + $0x30] sm:$0xff] }
 0x13b   : > { %1488 = vmatprep.mubr.f32.mxu0 %v3199_v0 }
 0x13c   : > { %v930_v57 = vmin.f32 %v928_v49, %v929_v53  ;;  %v920_v58 = vrot.slane %v919_v54, 2  ;;  %v1377_v49 = vld [vmem:[%s3193_s5 + $0x20] sm:$0xff] }
 0x13e   : > { %v931_v38 = vrot.slane %v930_v57, 4  ;;  %v921_v62 = vmin.f32 %v919_v54, %v920_v58  ;;  %1946 = vmatmul.mubr.msk.f32.gmra.mxu0 %vm1381_vm4, %v1376_v44 }
 0x13f   : > { %1494 = vmatprep.mubr.f32.mxu0 %v3199_v0 }
 0x140   : > { %v932_v2 = vmin.f32 %v930_v57, %v931_v38  ;;  %v922_v5 = vrot.slane %v921_v62, 1 }
 0x142   : > { %v933_v6 = vrot.slane %v932_v2, 2  ;;  %v2651_v12 = vmin.f32 %v921_v62, %v922_v5  ;;  %1947 = vmatmul.mubr.msk.f32.gmra.mxu0 %vm1381_vm4, %v1377_v49  ;;  %v1378_v62 = vld [vmem:[%s3193_s5 + $0x28] sm:$0xff] }
 0x143   : > { %1500 = vmatprep.mubr.f32.mxu0 %v3199_v0 }
 0x144   : > { %v934_v17 = vmin.f32 %v932_v2, %v933_v6  ;;  %vm937_vm7 = vcmp.eq.f32.partialorder %v2455_v46, %v2651_v12  ;;  %vm939_vm8 = vcmp.eq.f32.partialorder %v2460_v48, %v2651_v12  ;;  %vm941_vm9 = vcmp.eq.f32.partialorder %v2471_v35, %v2651_v12 }
 0x145   : > { %vm943_vm10 = vcmp.eq.f32.partialorder %v2476_v41, %v2651_v12  ;;  %vm945_vm11 = vcmp.eq.f32.partialorder %v2482_v55, %v2651_v12  ;;  %vm947_vm12 = vcmp.eq.f32.partialorder %v2487_v56, %v2651_v12  ;;  %vm949_vm13 = vcmp.eq.f32.partialorder %v2492_v32, %v2651_v12 }
 0x146   : > { %v935_v37 = vrot.slane %v934_v17, 1  ;;  %vm951_vm14 = vcmp.eq.f32.partialorder %v2523_v1, %v2651_v12  ;;  %v953_v18 = vsel %vm937_vm7, %v2377_v14, 64  ;;  %v955_v50 = vsel %vm939_vm8, %v2380_v19, 64  ;;  %1948 = vmatmul.mubr.msk.f32.gmra.mxu0 %vm1381_vm4, %v1378_v62 }
 0x147   : > { %v957_v30 = vsel %vm941_vm9, %v2383_v20, 64  ;;  %v959_v31 = vsel %vm943_vm10, %v2386_v21, 64  ;;  %v961_v33 = vsel %vm945_vm11, %v2389_v23, 64  ;;  %v963_v54 = vsel %vm947_vm12, %v2392_v24, 64  ;;  %1506 = vmatprep.mubr.f32.mxu0 %v3209_v61 }
 0x148   : > { %v936_v53 = vmin.f32 %v934_v17, %v935_v37  ;;  %v965_v28 = vsel %vm949_vm13, %v2395_v25, 64  ;;  %vm969_vm15 = vcmp.lt.s32.totalorder %v953_v18, %v957_v30  ;;  %v967_v57 = vsel %vm951_vm14, %v2402_v27, 64 }
 0x149   : > { %v970_v58 = vsel %vm969_vm15, %v953_v18, %v957_v30  ;;  %vm971_vm0 = vcmp.lt.s32.totalorder %v955_v50, %v959_v31  ;;  %v1031_v38 = vmax.f32 %v2651_v12, 1e-10 }
 0x14a   : > { %vm938_vm1 = vcmp.eq.f32.partialorder %v2560_v10, %v936_v53  ;;  %vm940_vm2 = vcmp.eq.f32.partialorder %v2565_v11, %v936_v53  ;;  %vm942_vm3 = vcmp.eq.f32.partialorder %v2571_v13, %v936_v53  ;;  %vm944_vm5 = vcmp.eq.f32.partialorder %v2576_v15, %v936_v53  ;;  %1949 = vmatmul.mubr.msk.f32.gmra.mxu0 %vm1381_vm4, %v1379_v40 }
 0x14b   : > { %vm946_vm6 = vcmp.eq.f32.partialorder %v2582_v16, %v936_v53  ;;  %vm948_vm7 = vcmp.eq.f32.partialorder %v2587_v45, %v936_v53  ;;  %vm950_vm8 = vcmp.eq.f32.partialorder %v2590_v36, %v936_v53  ;;  %vm952_vm9 = vcmp.eq.f32.partialorder %v2637_v43, %v936_v53  ;;  %1512 = vmatprep.mubr.f32.mxu0 %v3209_v61 }
 0x14c   : > { %v954_v3 = vsel %vm938_vm1, %v2377_v14, 64  ;;  %v956_v2 = vsel %vm940_vm2, %v2380_v19, 64  ;;  %v958_v5 = vsel %vm942_vm3, %v2383_v20, 64  ;;  %v960_v6 = vsel %vm944_vm5, %v2386_v21, 64 }
 0x14d   : > { %v962_v12 = vsel %vm946_vm6, %v2389_v23, 64  ;;  %v964_v44 = vsel %vm948_vm7, %v2392_v24, 64  ;;  %v966_v17 = vsel %vm950_vm8, %v2395_v25, 64  ;;  %v968_v37 = vsel %vm952_vm9, %v2402_v27, 64 }
 0x14e   : > { %vm992_vm10 = vcmp.lt.s32.totalorder %v954_v3, %v958_v5  ;;  %vm994_vm11 = vcmp.lt.s32.totalorder %v956_v2, %v960_v6  ;;  %v1032_v18 = vmax.f32 %v936_v53, 1e-10  ;;  %v972_v30 = vsel %vm971_vm0, %v955_v50, %v959_v31 }
 0x14f   : > { %v993_v49 = vsel %vm992_vm10, %v954_v3, %v958_v5  ;;  %v995_v0 = vsel %vm994_vm11, %v956_v2, %v960_v6  ;;  %vm973_vm12 = vcmp.lt.s32.totalorder %v970_v58, %v961_v33  ;;  %vm975_vm13 = vcmp.lt.s32.totalorder %v972_v30, %v963_v54 }
 0x150   : > { %vm996_vm14 = vcmp.lt.s32.totalorder %v993_v49, %v962_v12  ;;  %vm998_vm15 = vcmp.lt.s32.totalorder %v995_v0, %v964_v44  ;;  %2032 = vrcp.f32 %v1032_v18  ;;  %v974_v7 = vsel %vm973_vm12, %v970_v58, %v961_v33  ;;  %v1380_v33 = vld [vmem:[%s3193_s5 + $0x38] sm:$0xff] }
 0x151   : > { %v997_v34 = vsel %vm996_vm14, %v993_v49, %v962_v12  ;;  %v999_v53 = vsel %vm998_vm15, %v995_v0, %v964_v44  ;;  %v976_v4 = vsel %vm975_vm13, %v972_v30, %v963_v54  ;;  %vm977_vm0 = vcmp.lt.s32.totalorder %v974_v7, %v965_v28  ;;  %1950 = vmatmul.mubr.msk.f32.gmra.mxu0 %vm1381_vm4, %v1380_v33 }
 0x152   : > { %vm1000_vm1 = vcmp.lt.s32.totalorder %v997_v34, %v966_v17  ;;  %vm1002_vm2 = vcmp.lt.s32.totalorder %v999_v53, %v968_v37  ;;  %v978_v50 = vsel %vm977_vm0, %v974_v7, %v965_v28  ;;  %vm979_vm3 = vcmp.lt.s32.totalorder %v976_v4, %v967_v57 }
 0x153   : > { %v1001_v31 = vsel %vm1000_vm1, %v997_v34, %v966_v17  ;;  %v1003_v62 = vsel %vm1002_vm2, %v999_v53, %v968_v37  ;;  %v980_v3 = vsel %vm979_vm3, %v976_v4, %v967_v57  ;;  %2034 = vrcp.f32 %v1031_v38 }
 0x154   : > { %vm1004_vm5 = vcmp.lt.s32.totalorder %v1001_v31, %v1003_v62  ;;  %vm981_vm6 = vcmp.lt.s32.totalorder %v978_v50, %v980_v3 }
 0x155   : > { %v1005_v0 = vsel %vm1004_vm5, %v1001_v31, %v1003_v62  ;;  %v982_v54 = vsel %vm981_vm6, %v978_v50, %v980_v3 }
 0x156   : > { %v1006_v58 = vrot.slane %v1005_v0, 4  ;;  %v983_v2 = vrot.slane %v982_v54, 4 }
 0x158   : > { %vm1007_vm7 = vcmp.lt.s32.totalorder %v1005_v0, %v1006_v58  ;;  %vm984_vm8 = vcmp.lt.s32.totalorder %v982_v54, %v983_v2 }
 0x159   : > { %v1008_v7 = vsel %vm1007_vm7, %v1005_v0, %v1006_v58  ;;  %v985_v34 = vsel %vm984_vm8, %v982_v54, %v983_v2 }
 0x15a   : > { %v1009_v4 = vrot.slane %v1008_v7, 2  ;;  %v986_v40 = vrot.slane %v985_v34, 2 }
 0x15c   : > { %vm1010_vm9 = vcmp.lt.s32.totalorder %v1008_v7, %v1009_v4  ;;  %vm987_vm10 = vcmp.lt.s32.totalorder %v985_v34, %v986_v40 }
 0x15d   : > { %v2721_v28 = vpop.eup %2032  ;;  %v1011_v57 = vsel %vm1010_vm9, %v1008_v7, %v1009_v4  ;;  %v988_v38 = vsel %vm987_vm10, %v985_v34, %v986_v40 }
 0x15e   : > { %v1012_v5 = vrot.slane %v1011_v57, 1  ;;  %v989_v6 = vrot.slane %v988_v38, 1  ;;  %v2725_v12 = vadd.f32 %v2721_v28, %v2546_v8 }
 0x160   : > { %v2727_v44 = vpop.eup %2034  ;;  %vm1013_vm4 = vcmp.lt.s32.totalorder %v1011_v57, %v1012_v5  ;;  %vm990_vm11 = vcmp.lt.s32.totalorder %v988_v38, %v989_v6 }
 0x161   : > { %v2729_v17 = vsel %vm1013_vm4, %v1011_v57, %v1012_v5  ;;  %v2731_v37 = vsel %vm990_vm11, %v988_v38, %v989_v6  ;;  %v2735_v18 = vadd.f32 %v2727_v44, %v2444_v39  ;;  %v3210_v57 = vld [vmem:[#allocation6_spill] sm:$0xff]  ;;  %v3211_v38 = vld [vmem:[#allocation9_spill] sm:$0xff]  ;;  %v3212_v5 = vld [vmem:[#allocation7_spill] sm:$0xff] }
 0x162   : > { %vm1016_vm12 = vcmp.eq.s32.totalorder %v2377_v14, %v2729_v17  ;;  %vm1018_vm13 = vcmp.eq.s32.totalorder %v2380_v19, %v2729_v17  ;;  %vm1020_vm14 = vcmp.eq.s32.totalorder %v2383_v20, %v2729_v17  ;;  %vm1022_vm15 = vcmp.eq.s32.totalorder %v2386_v21, %v2729_v17  ;;  %v3213_v6 = vld [vmem:[#allocation10_spill] sm:$0xff] }
 0x163   : > { %vm1024_vm0 = vcmp.eq.s32.totalorder %v2389_v23, %v2729_v17  ;;  %vm1026_vm1 = vcmp.eq.s32.totalorder %v2392_v24, %v2729_v17  ;;  %vm1028_vm2 = vcmp.eq.s32.totalorder %v2395_v25, %v2729_v17  ;;  %vm1030_vm3 = vcmp.eq.s32.totalorder %v2402_v27, %v2729_v17 }
 0x164   : > { %v2755_v39 = vsel %vm1030_vm3, %v2721_v28, %v2555_v9  ;;  %v2761_v8 = vsel %vm1016_vm12, 1e+30, %v2560_v10  ;;  %v2767_v30 = vsel %vm1018_vm13, 1e+30, %v2565_v11  ;;  %v2773_v49 = vsel %vm1020_vm14, 1e+30, %v2571_v13 }
 0x165   : > { %v2779_v9 = vsel %vm1022_vm15, 1e+30, %v2576_v15  ;;  %v2785_v10 = vsel %vm1024_vm0, 1e+30, %v2582_v16  ;;  %v2791_v11 = vsel %vm1026_vm1, 1e+30, %v2587_v45  ;;  %v1084_v13 = vmin.f32 %v2761_v8, %v2773_v49 }
 0x166   : > { %v2799_v15 = vsel %vm1028_vm2, 1e+30, %v2590_v36  ;;  %v2802_v53 = vsel %vm1030_vm3, 1e+30, %v2637_v43  ;;  %v1085_v16 = vmin.f32 %v2767_v30, %v2779_v9  ;;  %vm1015_vm5 = vcmp.eq.s32.totalorder %v2377_v14, %v2731_v37 }
 0x167   : > { %v1086_v45 = vmin.f32 %v1084_v13, %v2785_v10  ;;  %vm1017_vm6 = vcmp.eq.s32.totalorder %v2380_v19, %v2731_v37  ;;  %vm1019_vm7 = vcmp.eq.s32.totalorder %v2383_v20, %v2731_v37  ;;  %vm1021_vm8 = vcmp.eq.s32.totalorder %v2386_v21, %v2731_v37 }
 0x168   : > { %v1087_v36 = vmin.f32 %v1085_v16, %v2791_v11  ;;  %vm1023_vm9 = vcmp.eq.s32.totalorder %v2389_v23, %v2731_v37  ;;  %vm1025_vm10 = vcmp.eq.s32.totalorder %v2392_v24, %v2731_v37  ;;  %vm1027_vm4 = vcmp.eq.s32.totalorder %v2395_v25, %v2731_v37  ;;  %v3214_v16 = vld [vmem:[#allocation8_spill] sm:$0xff] }
 0x169   : > { %v1088_v43 = vmin.f32 %v1086_v45, %v2799_v15  ;;  %vm1029_vm11 = vcmp.eq.s32.totalorder %v2402_v27, %v2731_v37  ;;  %v2829_v50 = vsel %vm1015_vm5, 1e+30, %v2455_v46  ;;  %v2835_v31 = vsel %vm1017_vm6, 1e+30, %v2460_v48 }
 0x16a   : > { %v1089_v62 = vmin.f32 %v1087_v36, %v2802_v53  ;;  %v2840_v3 = vsel %vm1029_vm11, %v2727_v44, %v2466_v52  ;;  %v2846_v33 = vsel %vm1019_vm7, 1e+30, %v2471_v35  ;;  %v2852_v46 = vsel %vm1021_vm8, 1e+30, %v2476_v41 }
 0x16b   : > { %v2858_v48 = vsel %vm1023_vm9, 1e+30, %v2482_v55  ;;  %v2864_v52 = vsel %vm1025_vm10, 1e+30, %v2487_v56  ;;  %v2870_v35 = vsel %vm1027_vm4, 1e+30, %v2492_v32  ;;  %v1071_v41 = vmin.f32 %v2829_v50, %v2846_v33 }
 0x16c   : > { %v1090_v0 = vmin.f32 %v1088_v43, %v1089_v62  ;;  %v2875_v54 = vsel %vm1029_vm11, 1e+30, %v2523_v1  ;;  %v1072_v55 = vmin.f32 %v2835_v31, %v2852_v46  ;;  %v2884_v56 = vsel %vm1028_vm2, %v2721_v28, %v2597_v22 }
 0x16d   : > { %v1073_v32 = vmin.f32 %v1071_v41, %v2858_v48  ;;  %v2892_v58 = vsel %vm1027_vm4, %v2727_v44, %v2503_v42  ;;  %v2899_v1 = vsel %vm1026_vm1, %v2721_v28, %v2602_v47  ;;  %v2906_v22 = vsel %vm1025_vm10, %v2727_v44, %v2508_v63 }
 0x16e   : > { %v1091_v2 = vrot.slane %v1090_v0, 4  ;;  %v1074_v7 = vmin.f32 %v1072_v55, %v2864_v52  ;;  %v2914_v42 = vsel %vm1024_vm0, %v2721_v28, %v2608_v60  ;;  %v2921_v47 = vsel %vm1023_vm9, %v2727_v44, %v2513_v51 }
 0x16f   : > { %v1075_v63 = vmin.f32 %v1073_v32, %v2870_v35  ;;  %v2929_v34 = vsel %vm1022_vm15, %v2721_v28, %v2613_v26  ;;  %v2936_v60 = vsel %vm1021_vm8, %v2727_v44, %v2518_v59  ;;  %v2943_v51 = vsel %vm1020_vm14, %v2721_v28, %v2618_v29 }
 0x170   : > { %v1092_v4 = vmin.f32 %v1090_v0, %v1091_v2  ;;  %v1076_v40 = vmin.f32 %v1074_v7, %v2875_v54  ;;  %v2951_v26 = vsel %vm1019_vm7, %v2727_v44, %v3210_v57  ;;  %v2958_v59 = vsel %vm1018_vm13, %v2721_v28, %v3211_v38 }
 0x171   : > { %v2965_v29 = vsel %vm1017_vm6, %v2727_v44, %v3212_v5  ;;  %v2972_v13 = vsel %vm1016_vm12, %v2721_v28, %v3213_v6  ;;  %v2979_v45 = vsel %vm1015_vm5, %v2727_v44, %v3214_v16 }
 0x172   : > { %v1093_v36 = vrot.slane %v1092_v4, 2  ;;  %v1077_v43 = vmin.f32 %v1075_v63, %v1076_v40 }
 0x174   : > { %v1094_v62 = vmin.f32 %v1092_v4, %v1093_v36  ;;  %v1078_v41 = vrot.slane %v1077_v43, 4 }
 0x176   : > { %v1095_v0 = vrot.slane %v1094_v62, 1  ;;  %v1079_v55 = vmin.f32 %v1077_v43, %v1078_v41 }
 0x178   : > { %v1096_v32 = vmin.f32 %v1094_v62, %v1095_v0  ;;  %v1080_v2 = vrot.slane %v1079_v55, 2 }
 0x17a   : > { %vm1098_vm13 = vcmp.eq.f32.partialorder %v2761_v8, %v1096_v32  ;;  %vm1100_vm12 = vcmp.eq.f32.partialorder %v2767_v30, %v1096_v32  ;;  %vm1102_vm14 = vcmp.eq.f32.partialorder %v2773_v49, %v1096_v32  ;;  %vm1104_vm15 = vcmp.eq.f32.partialorder %v2779_v9, %v1096_v32 }
 0x17b   : > { %vm1106_vm0 = vcmp.eq.f32.partialorder %v2785_v10, %v1096_v32  ;;  %vm1108_vm1 = vcmp.eq.f32.partialorder %v2791_v11, %v1096_v32  ;;  %v1114_v28 = vsel %vm1098_vm13, %v2377_v14, 64  ;;  %v1116_v44 = vsel %vm1100_vm12, %v2380_v19, 64 }
 0x17c   : > { %v1118_v17 = vsel %vm1102_vm14, %v2383_v20, 64  ;;  %v1120_v37 = vsel %vm1104_vm15, %v2386_v21, 64  ;;  %vm1110_vm2 = vcmp.eq.f32.partialorder %v2799_v15, %v1096_v32  ;;  %vm1112_vm3 = vcmp.eq.f32.partialorder %v2802_v53, %v1096_v32 }
 0x17d   : > { %vm1152_vm5 = vcmp.lt.s32.totalorder %v1114_v28, %v1118_v17  ;;  %vm1154_vm6 = vcmp.lt.s32.totalorder %v1116_v44, %v1120_v37  ;;  %v1192_v8 = vmax.f32 %v1096_v32, 1e-10  ;;  %v1081_v30 = vmin.f32 %v1079_v55, %v1080_v2 }
 0x17e   : > { %v1122_v49 = vsel %vm1106_vm0, %v2389_v23, 64  ;;  %v1124_v9 = vsel %vm1108_vm1, %v2392_v24, 64  ;;  %v1153_v10 = vsel %vm1152_vm5, %v1114_v28, %v1118_v17  ;;  %v1155_v11 = vsel %vm1154_vm6, %v1116_v44, %v1120_v37 }
 0x17f   : > { %vm1156_vm7 = vcmp.lt.s32.totalorder %v1153_v10, %v1122_v49  ;;  %vm1158_vm8 = vcmp.lt.s32.totalorder %v1155_v11, %v1124_v9  ;;  %2036 = vrcp.f32 %v1192_v8  ;;  %v1082_v7 = vrot.slane %v1081_v30, 1 }
 0x180   : > { %v1126_v63 = vsel %vm1110_vm2, %v2395_v25, 64  ;;  %v1128_v15 = vsel %vm1112_vm3, %v2402_v27, 64  ;;  %v1157_v4 = vsel %vm1156_vm7, %v1153_v10, %v1122_v49  ;;  %v1159_v53 = vsel %vm1158_vm8, %v1155_v11, %v1124_v9 }
 0x181   : > { %vm1160_vm9 = vcmp.lt.s32.totalorder %v1157_v4, %v1126_v63  ;;  %vm1162_vm10 = vcmp.lt.s32.totalorder %v1159_v53, %v1128_v15  ;;  %v1083_v40 = vmin.f32 %v1081_v30, %v1082_v7 }
 0x182   : > { %v1161_v57 = vsel %vm1160_vm9, %v1157_v4, %v1126_v63  ;;  %v1163_v38 = vsel %vm1162_vm10, %v1159_v53, %v1128_v15 }
 0x183   : > { %vm1164_vm4 = vcmp.lt.s32.totalorder %v1161_v57, %v1163_v38  ;;  %vm1097_vm11 = vcmp.eq.f32.partialorder %v2829_v50, %v1083_v40  ;;  %vm1099_vm13 = vcmp.eq.f32.partialorder %v2835_v31, %v1083_v40  ;;  %vm1101_vm12 = vcmp.eq.f32.partialorder %v2846_v33, %v1083_v40 }
 0x184   : > { %v1165_v5 = vsel %vm1164_vm4, %v1161_v57, %v1163_v38  ;;  %vm1103_vm14 = vcmp.eq.f32.partialorder %v2852_v46, %v1083_v40  ;;  %vm1105_vm15 = vcmp.eq.f32.partialorder %v2858_v48, %v1083_v40  ;;  %v1113_v16 = vsel %vm1097_vm11, %v2377_v14, 64 }
 0x185   : > { %v1166_v6 = vrot.slane %v1165_v5, 4  ;;  %vm1107_vm0 = vcmp.eq.f32.partialorder %v2864_v52, %v1083_v40  ;;  %v1115_v36 = vsel %vm1099_vm13, %v2380_v19, 64  ;;  %v1117_v43 = vsel %vm1101_vm12, %v2383_v20, 64 }
 0x186   : > { %v1119_v50 = vsel %vm1103_vm14, %v2386_v21, 64  ;;  %vm1109_vm2 = vcmp.eq.f32.partialorder %v2870_v35, %v1083_v40  ;;  %vm1111_vm3 = vcmp.eq.f32.partialorder %v2875_v54, %v1083_v40  ;;  %v1121_v31 = vsel %vm1105_vm15, %v2389_v23, 64 }
 0x187   : > { %vm1167_vm1 = vcmp.lt.s32.totalorder %v1165_v5, %v1166_v6  ;;  %vm1129_vm5 = vcmp.lt.s32.totalorder %v1113_v16, %v1117_v43  ;;  %vm1131_vm6 = vcmp.lt.s32.totalorder %v1115_v36, %v1119_v50  ;;  %v1191_v46 = vmax.f32 %v1083_v40, 1e-10 }
 0x188   : > { %v1168_v33 = vsel %vm1167_vm1, %v1165_v5, %v1166_v6  ;;  %v1123_v52 = vsel %vm1107_vm0, %v2392_v24, 64  ;;  %v1130_v62 = vsel %vm1129_vm5, %v1113_v16, %v1117_v43  ;;  %v1132_v41 = vsel %vm1131_vm6, %v1115_v36, %v1119_v50 }
 0x189   : > { %v1169_v48 = vrot.slane %v1168_v33, 2  ;;  %v1125_v0 = vsel %vm1109_vm2, %v2395_v25, 64  ;;  %vm1133_vm7 = vcmp.lt.s32.totalorder %v1130_v62, %v1121_v31  ;;  %vm1135_vm8 = vcmp.lt.s32.totalorder %v1132_v41, %v1123_v52 }
 0x18a   : > { %2038 = vrcp.f32 %v1191_v46  ;;  %v1127_v35 = vsel %vm1111_vm3, %v2402_v27, 64  ;;  %v1134_v54 = vsel %vm1133_vm7, %v1130_v62, %v1121_v31  ;;  %v1136_v55 = vsel %vm1135_vm8, %v1132_v41, %v1123_v52 }
 0x18b   : > { %vm1170_vm9 = vcmp.lt.s32.totalorder %v1168_v33, %v1169_v48  ;;  %vm1137_vm10 = vcmp.lt.s32.totalorder %v1134_v54, %v1125_v0  ;;  %vm1139_vm4 = vcmp.lt.s32.totalorder %v1136_v55, %v1127_v35 }
 0x18c   : > { %v2037_v32 = vpop.eup %2036  ;;  %v1171_v2 = vsel %vm1170_vm9, %v1168_v33, %v1169_v48  ;;  %v1138_v44 = vsel %vm1137_vm10, %v1134_v54, %v1125_v0  ;;  %v1140_v17 = vsel %vm1139_vm4, %v1136_v55, %v1127_v35 }
 0x18d   : > { %v1172_v28 = vrot.slane %v1171_v2, 1  ;;  %v3014_v37 = vadd.f32 %v2037_v32, %v2725_v12  ;;  %vm1141_vm11 = vcmp.lt.s32.totalorder %v1138_v44, %v1140_v17 }
 0x18e   : > { %v1142_v8 = vsel %vm1141_vm11, %v1138_v44, %v1140_v17 }
 0x18f   : > { %vm1173_vm13 = vcmp.lt.s32.totalorder %v1171_v2, %v1172_v28  ;;  %v1143_v49 = vrot.slane %v1142_v8, 4  ;;  %2040 = vrcp.f32 %v3014_v37 }
 0x190   : > { %v1174_v30 = vsel %vm1173_vm13, %v1171_v2, %v1172_v28 }
 0x191   : > { %vm1190_vm12 = vcmp.eq.s32.totalorder %v2402_v27, %v1174_v30  ;;  %vm1188_vm14 = vcmp.eq.s32.totalorder %v2395_v25, %v1174_v30  ;;  %vm1186_vm15 = vcmp.eq.s32.totalorder %v2392_v24, %v1174_v30  ;;  %vm1184_vm0 = vcmp.eq.s32.totalorder %v2389_v23, %v1174_v30 }
 0x192   : > { %v1214_v9 = vsel %vm1190_vm12, %v2037_v32, %v2755_v39  ;;  %vm1144_vm1 = vcmp.lt.s32.totalorder %v1142_v8, %v1143_v49  ;;  %v1212_v10 = vsel %vm1188_vm14, %v2037_v32, %v2884_v56  ;;  %v1210_v12 = vsel %vm1186_vm15, %v2037_v32, %v2899_v1 }
 0x193   : > { %1260 = vmatprep.subr.mxu1 %v1214_v9  ;;  %v1145_v11 = vsel %vm1144_vm1, %v1142_v8, %v1143_v49  ;;  %v1208_v7 = vsel %vm1184_vm0, %v2037_v32, %v2914_v42  ;;  %vm1182_vm2 = vcmp.eq.s32.totalorder %v2386_v21, %v1174_v30  ;;  %vm1180_vm3 = vcmp.eq.s32.totalorder %v2383_v20, %v1174_v30  ;;  %v1581_v8 = vpop.permute.xlu0 %1580  ;;  %v1576_v9 = vpop.permute.xlu1 %1575 }
 0x194   : > { %v1146_v63 = vrot.slane %v1145_v11, 2  ;;  %v1206_v15 = vsel %vm1182_vm2, %v2037_v32, %v2929_v34  ;;  %v1204_v4 = vsel %vm1180_vm3, %v2037_v32, %v2943_v51  ;;  %vm1178_vm5 = vcmp.eq.s32.totalorder %v2380_v19, %v1174_v30 }
 0x195   : > { %v1202_v39 = vsel %vm1178_vm5, %v2037_v32, %v2958_v59  ;;  %vm1176_vm6 = vcmp.eq.s32.totalorder %v2377_v14, %v1174_v30  ;;  %vm1219_vm0 = vcmask 523264  }
 0x196   : > { %vm1147_vm7 = vcmp.lt.s32.totalorder %v1145_v11, %v1146_v63  ;;  %v1200_v56 = vsel %vm1176_vm6, %v2037_v32, %v2972_v13 }
 0x197   : > { %v2039_v1 = vpop.eup %2038  ;;  %v1148_v42 = vsel %vm1147_vm7, %v1145_v11, %v1146_v63 }
 0x198   : > { %v1149_v53 = vrot.slane %v1148_v42, 1  ;;  %v3033_v40 = vadd.f32 %v2039_v1, %v2735_v18  ;;  %v479_v18 = vld [vmem:[%s446_s26 + $0x20] sm:$0xff] }
 0x19a   : > { %vm1150_vm8 = vcmp.lt.s32.totalorder %v1148_v42, %v1149_v53  ;;  %2042 = vrcp.f32 %v3033_v40 }
 0x19b   : > { %v1151_v57 = vsel %vm1150_vm8, %v1148_v42, %v1149_v53  ;;  %v1571_v53 = vpop.permute.xlu0 %1570 }
 0x19c   : > { %vm1189_vm9 = vcmp.eq.s32.totalorder %v2402_v27, %v1151_v57  ;;  %vm1187_vm10 = vcmp.eq.s32.totalorder %v2395_v25, %v1151_v57  ;;  %vm1185_vm4 = vcmp.eq.s32.totalorder %v2392_v24, %v1151_v57  ;;  %vm1183_vm11 = vcmp.eq.s32.totalorder %v2389_v23, %v1151_v57  ;;  %v2041_v17 = vpop.eup %2040 }
 0x19d   : > { %v1213_v34 = vsel %vm1189_vm9, %v2039_v1, %v2840_v3  ;;  %v1211_v51 = vsel %vm1187_vm10, %v2039_v1, %v2892_v58  ;;  %v1209_v59 = vsel %vm1185_vm4, %v2039_v1, %v2906_v22  ;;  %v1207_v13 = vsel %vm1183_vm11, %v2039_v1, %v2921_v47  ;;  %v480_v3 = vld [vmem:[%s446_s26 + $0x28] sm:$0xff]  ;;  %v481_v58 = vld [vmem:[%s446_s26 + $0x30] sm:$0xff]  ;;  %v482_v22 = vld [vmem:[%s446_s26 + $0x38] sm:$0xff] }
 0x19e   : > { %1261 = vmatpush1.msra.mxu1 %v1213_v34  ;;  %vm1181_vm13 = vcmp.eq.s32.totalorder %v2386_v21, %v1151_v57  ;;  %vm1179_vm12 = vcmp.eq.s32.totalorder %v2383_v20, %v1151_v57  ;;  %vm1177_vm14 = vcmp.eq.s32.totalorder %v2380_v19, %v1151_v57  ;;  %vm1175_vm15 = vcmp.eq.s32.totalorder %v2377_v14, %v1151_v57  ;;  %v475_v14 = vld [vmem:[%s446_s26] sm:$0xff]  ;;  %v476_v19 = vld [vmem:[%s446_s26 + $0x8] sm:$0xff]  ;;  %v477_v20 = vld [vmem:[%s446_s26 + $0x10] sm:$0xff] }
 0x19f   : > { %1262 = vmatprep.subr.mxu1 %v1212_v10  ;;  %v1205_v23 = vsel %vm1181_vm13, %v2039_v1, %v2936_v60  ;;  %v1203_v24 = vsel %vm1179_vm12, %v2039_v1, %v2951_v26  ;;  %v1201_v25 = vsel %vm1177_vm14, %v2039_v1, %v2965_v29  ;;  %v1199_v27 = vsel %vm1175_vm15, %v2039_v1, %v2979_v45  ;;  %v478_v21 = vld [vmem:[%s446_s26 + $0x18] sm:$0xff]  ;;  %s1965_s26 = sshll.u32 %s2112_s12, 10  ;;  %s3143_s12 = scalar_lea.sflag [#allocation3], %s419_s16 }
 0x1a0   : > { %1263 = vmatpush1.msra.mxu1 %v1211_v51  ;;  %s3135_s28 = scalar_lea.hbm %s3197_s9, %s1965_s26 }
 0x1a1   : > { %1264 = vmatprep.subr.mxu1 %v1210_v12 }
 0x1a2   : > { %1265 = vmatpush1.msra.mxu1 %v1209_v59 }
 0x1a3   : > { %1266 = vmatprep.subr.mxu1 %v1208_v7 }
 0x1a4   : > { %1267 = vmatpush1.msra.mxu1 %v1207_v13 }
 0x1a5   : > { %1268 = vmatprep.subr.mxu1 %v1206_v15 }
 0x1a6   : > { %1269 = vmatpush1.msra.mxu1 %v1205_v23  ;;  %v1566_v23 = vpop.permute.xlu1 %1565 }
 0x1a7   : > { %1270 = vmatprep.subr.mxu1 %v1204_v4  ;;  %v2043_v49 = vpop.eup %2042 }
 0x1a8   : > { %1271 = vmatpush1.msra.mxu1 %v1203_v24 }
 0x1a9   : > { %1272 = vmatprep.subr.mxu1 %v1202_v39 }
 0x1aa   : > { %1273 = vmatpush1.msra.mxu1 %v1201_v25 }
 0x1ab   : > { %1274 = vmatprep.subr.mxu1 %v1200_v56 }
 0x1ac   : > { %1275 = vmatpush1.msra.mxu1 %v1199_v27 }
 0x1ad   : > { %1935 = vmatmul.mubr.msk.f32.vlgmr.msra.gmra.mxu1 %vm1219_vm0, %v475_v14 }
 0x1ae   : > { %1314 = vmatprep.mubr.f32.mxu1 %v3209_v61 }
 0x1b1   : > { %1936 = vmatmul.mubr.msk.f32.gmra.mxu1 %vm1219_vm0, %v476_v19 }
 0x1b2   : > { %1320 = vmatprep.mubr.f32.mxu1 %v3209_v61 }
 0x1b5   : > { %1937 = vmatmul.mubr.msk.f32.gmra.mxu1 %vm1219_vm0, %v477_v20 }
 0x1b6   : > { %1326 = vmatprep.mubr.f32.mxu1 %v3209_v61 }
 0x1b9   : > { %1938 = vmatmul.mubr.msk.f32.gmra.mxu1 %vm1219_vm0, %v478_v21 }
 0x1ba   : > { %1332 = vmatprep.mubr.f32.mxu1 %v3209_v61 }
 0x1bd   : > { %1939 = vmatmul.mubr.msk.f32.gmra.mxu1 %vm1219_vm0, %v479_v18 }
 0x1be   : > { %1338 = vmatprep.mubr.f32.mxu1 %v3209_v61 }
 0x1c1   : > { %1940 = vmatmul.mubr.msk.f32.gmra.mxu1 %vm1219_vm0, %v480_v3 }
 0x1c2   : > { %1344 = vmatprep.mubr.f32.mxu1 %v3209_v61 }
 0x1c5   : > { %1941 = vmatmul.mubr.msk.f32.gmra.mxu1 %vm1219_vm0, %v481_v58 }
 0x1c6   : > { %1350 = vmatprep.mubr.f32.mxu1 %v3209_v61 }
 0x1c9   : > { %1942 = vmatmul.mubr.msk.f32.gmra.mxu1 %vm1219_vm0, %v482_v22 }
 0x1ca   : > { %1719 = vmatprep.mubr.f32.mxu1 %v3209_v61 }
 0x1f1   : > { %v3071_v47 = vpop.f32.mrf.mxu0 }
 0x1f3   : > { %v3073_v60 = vpop.f32.mrf.mxu0 }
 0x1f5   : > { %v3075_v26 = vpop.f32.mrf.mxu0 }
 0x1f7   : > { %v3077_v29 = vpop.f32.mrf.mxu0 }
 0x1fa   : > { %v3079_v45 = vpop.f32.mrf.mxu0 }
 0x1fc   : > { %v3081_v38 = vpop.f32.mrf.mxu0 }
 0x1fe   : > { %v3083_v5 = vpop.f32.mrf.mxu0 }
 0x200   : > { %v1492_v16 = vpop.f32.mrf.mxu0 }
 0x202   : > { %v1496_v50 = vpop.f32.mrf.mxu0 }
 0x204   : > { %v1498_v46 = vpop.f32.mrf.mxu0 }
 0x206   : > { %v1502_v62 = vpop.f32.mrf.mxu0 }
 0x208   : > { %v1504_v35 = vpop.f32.mrf.mxu0 }
 0x20a   : > { %v1508_v32 = vpop.f32.mrf.mxu0 }
 0x20c   : > { %v1510_v44 = vpop.f32.mrf.mxu0 }
 0x211   : > { %v1514_v37 = vpop.f32.mrf.mxu0 }
 0x213   : > { %v1516_v34 = vpop.f32.mrf.mxu0 }
 0x26d   : > { %v3085_v6 = vpop.f32.mrf.mxu1 }
 0x26f   : > { %v3087_v36 = vpop.f32.mrf.mxu1 }
 0x271   : > { %v1316_v43 = vpop.f32.mrf.mxu1 }
 0x273   : > { %v1318_v31 = vpop.f32.mrf.mxu1 }
 0x274   : > { %v1360_v22 = vmul.f32 %v2041_v17, %v1318_v31 }
 0x275   : > { %v1322_v33 = vpop.f32.mrf.mxu1 }
 0x276   : > { %v1361_v18 = vmul.f32 %v2043_v49, %v1322_v33  ;;  %v1556_v33 = vpop.permute.xlu1 %1555 }
 0x277   : > { %v1324_v48 = vpop.f32.mrf.mxu1 }
 0x278   : > { %v1362_v14 = vmul.f32 %v2041_v17, %v1324_v48 }
 0x279   : > { %v1328_v52 = vpop.f32.mrf.mxu1 }
 0x27a   : > { %v1363_v24 = vmul.f32 %v2043_v49, %v1328_v52  ;;  %v1358_v52 = vmul.f32 %v2041_v17, %v3087_v36  ;;  %v1524_v48 = vadd.f32 %v3081_v38, %v1362_v14 }
 0x27b   : > { %v1330_v41 = vpop.f32.mrf.mxu1 }
 0x27c   : > { %v1364_v51 = vmul.f32 %v2041_v17, %v1330_v41  ;;  %v1525_v41 = vadd.f32 %v3083_v5, %v1363_v24 }
 0x27d   : > { %v1334_v0 = vpop.f32.mrf.mxu1 }
 0x27e   : > { %v1365_v40 = vmul.f32 %v2043_v49, %v1334_v0 }
 0x27f   : > { %v1336_v54 = vpop.f32.mrf.mxu1 }
 0x280   : > { %v1366_v39 = vmul.f32 %v2041_v17, %v1336_v54  ;;  %v1527_v3 = vadd.f32 %v1496_v50, %v1365_v40  ;;  %v1526_v54 = vadd.f32 %v1492_v16, %v1364_v51  ;;  %v1357_v50 = vmul.f32 %v2043_v49, %v3085_v6  ;;  %v1617_v40 = vld [vmem:[%s3195_s7 + $0x10] sm:$0xff] }
 0x281   : > { %v1340_v55 = vpop.f32.mrf.mxu1  ;;  %v1523_v16 = vadd.f32 %v3079_v45, %v1361_v18 }
 0x282   : > { %v1367_v15 = vmul.f32 %v2043_v49, %v1340_v55  ;;  %v1528_v19 = vadd.f32 %v1498_v46, %v1366_v39  ;;  %v1591_v31 = vadd.f32 %v1566_v23, %v1527_v3  ;;  %v1519_v45 = vadd.f32 %v3071_v47, %v1357_v50 }
 0x283   : > { %v1342_v2 = vpop.f32.mrf.mxu1 }
 0x284   : > { %v1368_v7 = vmul.f32 %v2041_v17, %v1342_v2  ;;  %v1529_v25 = vadd.f32 %v1502_v62, %v1367_v15  ;;  %v1359_v2 = vmul.f32 %v2043_v49, %v1316_v43  ;;  %v1592_v46 = vadd.f32 %v1566_v23, %v1528_v19 }
 0x285   : > { %v1346_v28 = vpop.f32.mrf.mxu1  ;;  %v1522_v43 = vadd.f32 %v3077_v29, %v1360_v22 }
 0x286   : > { %v1369_v12 = vmul.f32 %v2043_v49, %v1346_v28  ;;  %v1530_v59 = vadd.f32 %v1504_v35, %v1368_v7  ;;  %v1593_v35 = vadd.f32 %v1571_v53, %v1529_v25  ;;  %v1521_v36 = vadd.f32 %v3075_v26, %v1359_v2 }
 0x287   : > { %v1348_v30 = vpop.f32.mrf.mxu1 }
 0x288   : > { %v1370_v10 = vmul.f32 %v2041_v17, %v1348_v30  ;;  %v1531_v57 = vadd.f32 %v1508_v32, %v1369_v12  ;;  %v1594_v55 = vadd.f32 %v1571_v53, %v1530_v59  ;;  %v1561_v32 = vpop.permute.xlu0 %1560  ;;  %v1609_v38 = vmax.f32 %v1593_v35, 0.0  ;;  %v1616_v53 = vld [vmem:[%s3195_s7 + $0x8] sm:$0xff] }
 0x289   : > { %v1352_v11 = vpop.f32.mrf.mxu1  ;;  %v1590_v5 = vadd.f32 %v1561_v32, %v1526_v54  ;;  %v1520_v30 = vadd.f32 %v3073_v60, %v1358_v52  ;;  %v1607_v12 = vmax.f32 %v1591_v31, 0.0 }
 0x28a   : > { %v1371_v63 = vmul.f32 %v2043_v49, %v1352_v11  ;;  %v1532_v56 = vadd.f32 %v1510_v44, %v1370_v10  ;;  %v1595_v58 = vadd.f32 %v1576_v9, %v1531_v57  ;;  %v1608_v10 = vmax.f32 %v1592_v46, 0.0  ;;  %v1618_v57 = vld [vmem:[%s3195_s7 + $0x18] sm:$0xff] }
 0x28b   : > { %v1354_v4 = vpop.f32.mrf.mxu1  ;;  %v1587_v49 = vadd.f32 %v1556_v33, %v1523_v16  ;;  %v1606_v11 = vmax.f32 %v1590_v5, 0.0 }
 0x28c   : > { %v1533_v1 = vadd.f32 %v1514_v37, %v1371_v63  ;;  %v1372_v42 = vmul.f32 %v2041_v17, %v1354_v4  ;;  %v1596_v20 = vadd.f32 %v1576_v9, %v1532_v56  ;;  %v1611_v44 = vmax.f32 %v1595_v58, 0.0  ;;  %v1551_v6 = vpop.permute.xlu0 %1550  ;;  %v1546_v37 = vpop.permute.xlu1 %1545 }
 0x28d   : > { %v1589_v17 = vadd.f32 %v1561_v32, %v1525_v41  ;;  %v1588_v9 = vadd.f32 %v1556_v33, %v1524_v48  ;;  %v1586_v29 = vadd.f32 %v1551_v6, %v1522_v43  ;;  %v1585_v7 = vadd.f32 %v1551_v6, %v1521_v36 }
 0x28e   : > { %v1534_v13 = vadd.f32 %v1516_v34, %v1372_v42  ;;  %v1597_v27 = vadd.f32 %v1581_v8, %v1533_v1  ;;  %v1612_v62 = vmax.f32 %v1596_v20, 0.0  ;;  %v1584_v63 = vadd.f32 %v1546_v37, %v1520_v30  ;;  %v1615_v42 = vld [vmem:[%s3195_s7] sm:$0xff] }
 0x28f   : > { %v1605_v26 = vmax.f32 %v1589_v17, 0.0  ;;  %v1604_v15 = vmax.f32 %v1588_v9, 0.0  ;;  %v1583_v60 = vadd.f32 %v1546_v37, %v1519_v45  ;;  %v1603_v4 = vmax.f32 %v1587_v49, 0.0 }
 0x290   : > { %v1598_v21 = vadd.f32 %v1581_v8, %v1534_v13  ;;  %v1613_v28 = vmax.f32 %v1597_v27, 0.0  ;;  %v1610_v8 = vmax.f32 %v1594_v55, 0.0  ;;  %v1602_v39 = vmax.f32 %v1586_v29, 0.0  ;;  %v1626_v34 = vpop.permute.xlu0 %1625  ;;  %v1631_v25 = vpop.permute.xlu1 %1630 }
 0x291   : > { %v1601_v56 = vmax.f32 %v1585_v7, 0.0  ;;  %v1600_v47 = vmax.f32 %v1584_v63, 0.0  ;;  %v1599_v1 = vmax.f32 %v1583_v60, 0.0 }
 0x292   : > { %v1614_v0 = vmax.f32 %v1598_v21, 0.0 }
 0x294   : > { %1671 = vmatprep.subr.mxu1 %v1614_v0  ;;  %v1636_v18 = vpop.permute.xlu0 %1635  ;;  %v1641_v32 = vpop.permute.xlu1 %1640 }
 0x295   : > { %1672 = vmatpush1.msra.mxu1 %v1613_v28 }
 0x296   : > { %1673 = vmatprep.subr.mxu1 %v1612_v62 }
 0x297   : > { %1674 = vmatpush1.msra.mxu1 %v1611_v44 }
 0x298   : > { %1675 = vmatprep.subr.mxu1 %v1610_v8 }
 0x299   : > { %1676 = vmatpush1.msra.mxu1 %v1609_v38 }
 0x29a   : > { %1677 = vmatprep.subr.mxu1 %v1608_v10 }
 0x29b   : > { %1678 = vmatpush1.msra.mxu1 %v1607_v12 }
 0x29c   : > { %1679 = vmatprep.subr.mxu1 %v1606_v11 }
 0x29d   : > { %1680 = vmatpush1.msra.mxu1 %v1605_v26 }
 0x29e   : > { %1681 = vmatprep.subr.mxu1 %v1604_v15 }
 0x29f   : > { %1682 = vmatpush1.msra.mxu1 %v1603_v4 }
 0x2a0   : > { %1683 = vmatprep.subr.mxu1 %v1602_v39 }
 0x2a1   : > { %1684 = vmatpush1.msra.mxu1 %v1601_v56 }
 0x2a2   : > { %1685 = vmatprep.subr.mxu1 %v1600_v47 }
 0x2a3   : > { %1686 = vmatpush1.msra.mxu1 %v1599_v1 }
 0x2a4   : > { %1951 = vmatmul.mubr.msk.f32.vlgmr.msra.gmra.mxu1 %vm1219_vm0, %v1615_v42 }
 0x2a5   : > { %1725 = vmatprep.mubr.f32.mxu1 %v3209_v61 }
 0x2a8   : > { %1952 = vmatmul.mubr.msk.f32.gmra.mxu1 %vm1219_vm0, %v1616_v53 }
 0x2a9   : > { %1731 = vmatprep.mubr.f32.mxu1 %v3209_v61 }
 0x2ac   : > { %1953 = vmatmul.mubr.msk.f32.gmra.mxu1 %vm1219_vm0, %v1617_v40 }
 0x2ad   : > { %1737 = vmatprep.mubr.f32.mxu1 %v3209_v61 }
 0x2b0   : > { %1954 = vmatmul.mubr.msk.f32.gmra.mxu1 %vm1219_vm0, %v1618_v57 }
 0x364   : > { %v1721_v51 = vpop.f32.mrf.mxu1 }
 0x365   : > { %v1722_v59 = vadd.f32 %v1721_v51, %v1626_v34 }
 0x366   : > { %v1723_v13 = vpop.f32.mrf.mxu1 }
 0x367   : > { %v1744_v23 = vmax.f32 %v1722_v59, 0.0  ;;  %v1724_v24 = vadd.f32 %v1723_v13, %v1626_v34 }
 0x368   : > { %v1727_v27 = vpop.f32.mrf.mxu1 }
 0x369   : > { %1752 = vst [vmem:[%s3122_s24] sm:$0xff] %v1744_v23  ;;  %v1745_v61 = vmax.f32 %v1724_v24, 0.0  ;;  %v1728_v14 = vadd.f32 %v1727_v27, %v1631_v25 }
 0x36a   : > { %v1729_v19 = vpop.f32.mrf.mxu1 }
 0x36b   : > { %1753 = vst [vmem:[%s3122_s24 + $0x8] sm:$0xff] %v1745_v61  ;;  %v1746_v20 = vmax.f32 %v1728_v14, 0.0  ;;  %v1730_v21 = vadd.f32 %v1729_v19, %v1631_v25 }
 0x36c   : > { %v1733_v3 = vpop.f32.mrf.mxu1 }
 0x36d   : > { %1754 = vst [vmem:[%s3122_s24 + $0x10] sm:$0xff] %v1746_v20  ;;  %v1747_v58 = vmax.f32 %v1730_v21, 0.0  ;;  %v1734_v22 = vadd.f32 %v1733_v3, %v1636_v18 }
 0x36e   : > { %v1735_v54 = vpop.f32.mrf.mxu1 }
 0x36f   : > { %1755 = vst [vmem:[%s3122_s24 + $0x18] sm:$0xff] %v1747_v58  ;;  %v1748_v55 = vmax.f32 %v1734_v22, 0.0  ;;  %v1736_v0 = vadd.f32 %v1735_v54, %v1636_v18 }
 0x370   : > { %v1739_v2 = vpop.f32.mrf.mxu1 }
 0x371   : > { %1756 = vst [vmem:[%s3122_s24 + $0x20] sm:$0xff] %v1748_v55  ;;  %v1749_v41 = vmax.f32 %v1736_v0, 0.0  ;;  %v1740_v35 = vadd.f32 %v1739_v2, %v1641_v32 }
 0x372   : > { %v1741_v28 = vpop.f32.mrf.mxu1 }
 0x373   : > { %1757 = vst [vmem:[%s3122_s24 + $0x28] sm:$0xff] %v1749_v41  ;;  %v1750_v52 = vmax.f32 %v1740_v35, 0.0  ;;  %v1742_v48 = vadd.f32 %v1741_v28, %v1641_v32 }
 0x375   : > { %1758 = vst [vmem:[%s3122_s24 + $0x30] sm:$0xff] %v1750_v52  ;;  %v1751_v46 = vmax.f32 %v1742_v48, 0.0 }
 0x377   : > { %1759 = vst [vmem:[%s3122_s24 + $0x38] sm:$0xff] %v1751_v46 }
 0x378   : > { %2057 = shalt.err (!%p2054_p5)
}
 0x379   : > { %s2058_s16 = scalar_lea.hbm %s3135_s28, 1024  ;;  %s2062_s26 = scalar_lea.hbm %s3197_s9, 2048 }
 0x37a   : > { %p2059_p6 = scmp.ne.s32.totalorder %s3135_s28, %s2058_s16  ;;  %p2063_p10 = scmp.lt.s32.totalorder %s3135_s28, %s3197_s9 }
 0x37b   : > { %p2064_p11 = scmp.lt.s32.totalorder %s2062_s26, %s2058_s16 }
 0x37c   : > { %p2060_p7 = pnand %p2059_p6, %p2217_p4 }
 0x37d   : > { %p2065_p12 = por %p2064_p11, %p2063_p10 }
 0x37e   : > { %p2061_p9 = pneg %p2060_p7 }
 0x380   : > { %p2066_p13 = pnand %p2065_p12, %p2061_p9 }
 0x382   : > { %2069 = shalt.err (!%p2066_p13)
}
 0x383   : > { %s2125_s29 = smov 256   ;;  %s2126_s15 = smov 16  }
 0x384   : > { %1966 = dma.vmem_to_hbm [thread:$0]  (%p2217_p4), %s3137_s25, 1024, %s3135_s28, %s3143_s12, %s2125_s29, %s2125_s29, %s2126_s15  }
 0x385 PF: > { %p1972_p0 = scmp.ge.s32.totalorder %s2120_s14, 2  ;;  %s1791_s18 = sand.u32 1, %s2100_s30  }
 0x386   : > { %s1792_s20 = scalar_lea.sflag [#allocation3], %s1791_s18 }
 0x387   : > { %p1969_p1 = pnand %p1972_p0, %p2224_p8 }
 0x389   : > { %p1970_p2 = pneg %p1969_p1 }
 0x38b   : > { %2095 = dma.done.wait (%p1970_p2), %s1792_s20, 1024  }
 0x38c   : > { %2097 = vsyncadd (%p1970_p2), %s1792_s20, 4294966272  ;;  %s22_s14 = sadd.s32 1, %s2120_s14   ;;  %s3215_s19 = sld [smem:[#allocation5_spill]] }
 0x38d   : > { %p19_p3 = scmp.ge.s32.totalorder %s22_s14, 4   ;;  %s3216_s30 = smov %s2104_s10 }
 0x38e   : > { %s3217_s10 = smov %s2108_s11  ;;  %s3218_s11 = smov %s2230_s22 }
 0x38f   : > { %s3219_s12 = smov %s2116_s13  ;;  %21 = sbr.rel (!%p19_p3) target bundleno = 4 (0x4), region = 103 }
 0x392   : > { %s3220_s13 = smov %s3215_s19 }
 0x394   :  { %1797 = vsyncpa [#allocation3], 1 }
 0x395   :  { %1799 = vsyncpa [#allocation3 + $0x1], 1 }

</bundles_post_ra>
